<compile_context>
chip_gen: v5e
topology: v5e:2x2
jax: 0.10.0
libtpu: 0.0.40
codegen_flags: <defaults>
</compile_context>

<pallas_src>
import functools

import numpy as np

import jax
import jax.numpy as jnp
from jax.experimental import pallas as pl
from jax.experimental.pallas import tpu as pltpu


# ----------------------------- fused DownBlock kernel -----------------------------

def _down_block_kernel(*args, Ho, Wo, Cin, couts):
    """Fused maxpool(2x2) -> [Conv3x3(same) + BN(eval) + ReLU] x L for one batch element.

    args (refs, in order):
      xr_ref                      : (1, Ho, 2, Wo, 2*Cin)  pool-friendly input view
      per layer i: w_ref, s_ref, b_ref
          layers 0..L-2 : w (9, cin_i, cout_i),  s/b (1, cout_i)
          layer  L-1    : w (9, cout_L, cin_L),  s/b (cout_L, 1)   (transposed form)
      o_ref                       : (1, cout_{L-1}, Ho*Wo)  NCHW-flattened output
      pad_ref_i (VMEM scratch)    : (Ho+2, Wo+2, cin_i)     zero-padded activations
    """
    L = len(couts)
    xr_ref = args[0]
    layer_refs = args[1:1 + 3 * L]
    o_ref = args[1 + 3 * L]
    pad_refs = args[2 + 3 * L:]

    # ---- 2x2 max pool (VPU). The 2x2 window was folded into a major axis (H-pair) and
    # the lane axis (W-pair interleaved with C) by a free reshape in the wrapper. ----
    a = xr_ref[0, :, 0, :, pl.ds(0, Cin)]        # (Ho, Wo, Cin)
    b = xr_ref[0, :, 0, :, pl.ds(Cin, Cin)]
    c = xr_ref[0, :, 1, :, pl.ds(0, Cin)]
    d = xr_ref[0, :, 1, :, pl.ds(Cin, Cin)]
    cur = jnp.maximum(jnp.maximum(a, b), jnp.maximum(c, d))   # (Ho, Wo, Cin)
    cur_c = Cin

    for layer in range(L):
        w_ref = layer_refs[3 * layer]
        s_ref = layer_refs[3 * layer + 1]
        b_ref = layer_refs[3 * layer + 2]
        pad_ref = pad_refs[layer]
        cout = couts[layer]
        last = layer == L - 1

        # 'same' zero padding entirely inside VMEM scratch.
        pad_ref[...] = jnp.zeros_like(pad_ref)
        pad_ref[pl.ds(1, Ho), pl.ds(1, Wo), :] = cur

        # Conv3x3 = 9 accumulating matmuls with M = Ho*Wo (one per filter tap).
        if not last:
            acc = jnp.zeros((Ho * Wo, cout), jnp.float32)
        else:
            acc = jnp.zeros((cout, Ho * Wo), jnp.float32)

        for dy in range(3):
            for dx in range(3):
                patch = pad_ref[pl.ds(dy, Ho), pl.ds(dx, Wo), :]   # (Ho, Wo, cur_c)
                patch = patch.reshape(Ho * Wo, cur_c)              # layout no-op collapse
                w_k = w_ref[3 * dy + dx]
                if not last:
                    acc = acc + jnp.dot(patch, w_k,
                                        preferred_element_type=jnp.float32)
                else:
                    # accumulate the transposed result directly: (cout, Ho*Wo)
                    acc = acc + jnp.einsum("oc,pc->op", w_k, patch,
                                           preferred_element_type=jnp.float32)

        # folded conv-bias + BatchNorm(eval) + ReLU
        acc = jnp.maximum(acc * s_ref[...] + b_ref[...], 0.0)

        if not last:
            cur = acc.reshape(Ho, Wo, cout)
            cur_c = cout
        else:
            o_ref[0] = acc       # lane-dense (cout, Ho*Wo) store, NCHW-flat layout


# ------------------------------ parameter setup --------------------------------

def init_conv_bn_params(key, cin, cout):
    k1, k2, k3, k4, k5, k6 = jax.random.split(key, 6)
    return dict(
        w=jax.random.normal(k1, (3, 3, cin, cout), jnp.float32) * 0.1,   # HWIO
        conv_b=jax.random.normal(k2, (cout,), jnp.float32) * 0.1,
        gamma=1.0 + 0.1 * jax.random.normal(k3, (cout,), jnp.float32),
        beta=0.1 * jax.random.normal(k4, (cout,), jnp.float32),
        mean=0.1 * jax.random.normal(k5, (cout,), jnp.float32),
        var=jnp.abs(jax.random.normal(k6, (cout,), jnp.float32)) + 1.0,
    )


def fold_bn(p, eps=1e-5):
    scale = p["gamma"] / jnp.sqrt(p["var"] + eps)
    bias = (p["conv_b"] - p["mean"]) * scale + p["beta"]
    return scale, bias


# ------------------------------- DownBlock forward -----------------------------

@jax.jit
def down_block_forward(x_nchw, params):
    # x_nchw: (N, Cin, H, W) float32, H and W even. params: list of ConvBatchNorm params.
    N, Cin, H, W = x_nchw.shape
    Ho, Wo = H // 2, W // 2
    L = len(params)
    couts = tuple(int(p["w"].shape[-1]) for p in params)

    # NCHW -> pool-friendly NHWC view (one tiny XLA glue copy for the input only).
    xr = jnp.transpose(x_nchw, (0, 2, 3, 1)).reshape(N, Ho, 2, Wo, 2 * Cin)

    inputs = [xr]
    in_specs = [pl.BlockSpec((1, Ho, 2, Wo, 2 * Cin), lambda n: (n, 0, 0, 0, 0))]
    scratch = []
    cin = Cin
    for i, p in enumerate(params):
        cout = couts[i]
        scale, bias = fold_bn(p)
        last = i == L - 1
        if not last:
            w = p["w"].reshape(9, cin, cout).astype(jnp.float32)
            s = scale.reshape(1, cout).astype(jnp.float32)
            b = bias.reshape(1, cout).astype(jnp.float32)
            in_specs += [pl.BlockSpec((9, cin, cout), lambda n: (0, 0, 0)),
                         pl.BlockSpec((1, cout), lambda n: (0, 0)),
                         pl.BlockSpec((1, cout), lambda n: (0, 0))]
        else:
            # last layer: weights / scale / bias in transposed form for the lane-dense store
            w = jnp.transpose(p["w"], (0, 1, 3, 2)).reshape(9, cout, cin).astype(jnp.float32)
            s = scale.reshape(cout, 1).astype(jnp.float32)
            b = bias.reshape(cout, 1).astype(jnp.float32)
            in_specs += [pl.BlockSpec((9, cout, cin), lambda n: (0, 0, 0)),
                         pl.BlockSpec((cout, 1), lambda n: (0, 0)),
                         pl.BlockSpec((cout, 1), lambda n: (0, 0))]
        inputs += [w, s, b]
        scratch.append(pltpu.VMEM((Ho + 2, Wo + 2, cin), jnp.float32))
        cin = cout

    kernel = functools.partial(_down_block_kernel, Ho=Ho, Wo=Wo, Cin=Cin, couts=couts)
    out_flat = pl.pallas_call(
        kernel,
        out_shape=jax.ShapeDtypeStruct((N, couts[-1], Ho * Wo), jnp.float32),
        grid=(N,),
        in_specs=in_specs,
        out_specs=pl.BlockSpec((1, couts[-1], Ho * Wo), lambda n: (n, 0, 0)),
        scratch_shapes=scratch,
        compiler_params=pltpu.CompilerParams(dimension_semantics=("parallel",)),
    )(*inputs)
    # NCHW-flat -> NCHW (contiguous reshape, free)
    return out_flat.reshape(N, couts[-1], Ho, Wo)


# ------------------------------ pure-JAX reference ------------------------------

def ref_down_block(x_nchw, params, eps=1e-5):
    x = jnp.transpose(x_nchw, (0, 2, 3, 1))
    x = jax.lax.reduce_window(x, -jnp.inf, jax.lax.max,
                              (1, 2, 2, 1), (1, 2, 2, 1), "VALID")
    for p in params:
        y = jax.lax.conv_general_dilated(
            x, p["w"], (1, 1), "SAME",
            dimension_numbers=("NHWC", "HWIO", "NHWC"))
        y = y + p["conv_b"]
        y = (y - p["mean"]) / jnp.sqrt(p["var"] + eps) * p["gamma"] + p["beta"]
        x = jnp.maximum(y, 0.0)
    return jnp.transpose(x, (0, 3, 1, 2))


if __name__ == "__main__":
    key = jax.random.PRNGKey(0)
    kx, k0, k1 = jax.random.split(key, 3)

    # DownBlock(in_channels=4, out_channels=8, nb_Conv=2), input (2, 4, 16, 16)
    N, Cin, H, W = 2, 4, 16, 16
    Cout = 8
    x = jax.random.normal(kx, (N, Cin, H, W), jnp.float32)
    params = [init_conv_bn_params(k0, Cin, Cout),
              init_conv_bn_params(k1, Cout, Cout)]

    out = down_block_forward(x, params)
    out = jax.block_until_ready(out)
    assert out.shape == (N, Cout, H // 2, W // 2)

    ref = ref_down_block(x, params)
    np.testing.assert_allclose(np.asarray(out), np.asarray(ref),
                               atol=2e-3, rtol=2e-3)
    print("KERNEL_OK")
</pallas_src>

<mosaic_0001>
module attributes {stable_mosaic.version = 11 : i64} {
  func.func @_down_block_kernel(%arg0: i32, %arg1: memref<1x8x2x8x8xf32, #tpu.memory_space<vmem>>, %arg2: memref<9x4x8xf32, #tpu.memory_space<vmem>>, %arg3: memref<1x8xf32, #tpu.memory_space<vmem>>, %arg4: memref<1x8xf32, #tpu.memory_space<vmem>>, %arg5: memref<9x8x8xf32, #tpu.memory_space<vmem>>, %arg6: memref<8x1xf32, #tpu.memory_space<vmem>>, %arg7: memref<8x1xf32, #tpu.memory_space<vmem>>, %arg8: memref<1x8x64xf32, #tpu.memory_space<vmem>>, %arg9: memref<10x10x4xf32, #tpu.memory_space<vmem>>, %arg10: memref<10x10x8xf32, #tpu.memory_space<vmem>>) attributes {dimension_semantics = [#tpu.dimension_semantics<parallel>], iteration_bounds = array<i64: 2>, scalar_prefetch = 0 : i64, scratch_operands = 2 : i64, tpu.core_type = #tpu.core_type<tc>, window_params = [{transform_indices = @transform_0, window_bounds = array<i64: 1, 8, 2, 8, 8>}, {pipeline_mode = #tpu.pipeline_mode<synchronous>, transform_indices = @transform_1, window_bounds = array<i64: 9, 4, 8>}, {pipeline_mode = #tpu.pipeline_mode<synchronous>, transform_indices = @transform_2, window_bounds = array<i64: 1, 8>}, {pipeline_mode = #tpu.pipeline_mode<synchronous>, transform_indices = @transform_3, window_bounds = array<i64: 1, 8>}, {pipeline_mode = #tpu.pipeline_mode<synchronous>, transform_indices = @transform_4, window_bounds = array<i64: 9, 8, 8>}, {pipeline_mode = #tpu.pipeline_mode<synchronous>, transform_indices = @transform_5, window_bounds = array<i64: 8, 1>}, {pipeline_mode = #tpu.pipeline_mode<synchronous>, transform_indices = @transform_6, window_bounds = array<i64: 8, 1>}, {transform_indices = @transform_7, window_bounds = array<i64: 1, 8, 64>}]} {
    %c0 = arith.constant 0 : index
    %c0_0 = arith.constant 0 : index
    %c0_1 = arith.constant 0 : index
    %c0_2 = arith.constant 0 : index
    %c0_3 = arith.constant 0 : index
    %0 = vector.load %arg1[%c0, %c0_0, %c0_1, %c0_2, %c0_3] : memref<1x8x2x8x8xf32, #tpu.memory_space<vmem>>, vector<1x8x1x8x4xf32>
    %1 = vector.shape_cast %0 : vector<1x8x1x8x4xf32> to vector<8x8x4xf32>
    %c0_4 = arith.constant 0 : index
    %c0_5 = arith.constant 0 : index
    %c0_6 = arith.constant 0 : index
    %c0_7 = arith.constant 0 : index
    %c4 = arith.constant 4 : index
    %2 = vector.load %arg1[%c0_4, %c0_5, %c0_6, %c0_7, %c4] : memref<1x8x2x8x8xf32, #tpu.memory_space<vmem>>, vector<1x8x1x8x4xf32>
    %3 = vector.shape_cast %2 : vector<1x8x1x8x4xf32> to vector<8x8x4xf32>
    %c0_8 = arith.constant 0 : index
    %c0_9 = arith.constant 0 : index
    %c1 = arith.constant 1 : index
    %c0_10 = arith.constant 0 : index
    %c0_11 = arith.constant 0 : index
    %4 = vector.load %arg1[%c0_8, %c0_9, %c1, %c0_10, %c0_11] : memref<1x8x2x8x8xf32, #tpu.memory_space<vmem>>, vector<1x8x1x8x4xf32>
    %5 = vector.shape_cast %4 : vector<1x8x1x8x4xf32> to vector<8x8x4xf32>
    %c0_12 = arith.constant 0 : index
    %c0_13 = arith.constant 0 : index
    %c1_14 = arith.constant 1 : index
    %c0_15 = arith.constant 0 : index
    %c4_16 = arith.constant 4 : index
    %6 = vector.load %arg1[%c0_12, %c0_13, %c1_14, %c0_15, %c4_16] : memref<1x8x2x8x8xf32, #tpu.memory_space<vmem>>, vector<1x8x1x8x4xf32>
    %7 = vector.shape_cast %6 : vector<1x8x1x8x4xf32> to vector<8x8x4xf32>
    %8 = arith.maximumf %1, %3 : vector<8x8x4xf32>
    %9 = arith.maximumf %5, %7 : vector<8x8x4xf32>
    %10 = arith.maximumf %8, %9 : vector<8x8x4xf32>
    %cst = arith.constant 0.000000e+00 : f32
    %11 = vector.broadcast %cst : f32 to vector<10x10x4xf32>
    %c0_17 = arith.constant 0 : index
    %c0_18 = arith.constant 0 : index
    %c0_19 = arith.constant 0 : index
    %12 = vector.load %arg9[%c0_17, %c0_18, %c0_19] : memref<10x10x4xf32, #tpu.memory_space<vmem>>, vector<10x10x4xf32>
    tpu.vector_store %arg9[%c0_17, %c0_18, %c0_19], %11 {strides = array<i32>} : memref<10x10x4xf32, #tpu.memory_space<vmem>>, vector<10x10x4xf32>,
    %c1_20 = arith.constant 1 : index
    %c1_21 = arith.constant 1 : index
    %c0_22 = arith.constant 0 : index
    %13 = vector.load %arg9[%c1_20, %c1_21, %c0_22] : memref<10x10x4xf32, #tpu.memory_space<vmem>>, vector<8x8x4xf32>
    tpu.vector_store %arg9[%c1_20, %c1_21, %c0_22], %10 {strides = array<i32>} : memref<10x10x4xf32, #tpu.memory_space<vmem>>, vector<8x8x4xf32>,
    %cst_23 = arith.constant 0.000000e+00 : f32
    %14 = vector.broadcast %cst_23 : f32 to vector<64x8xf32>
    %c0_24 = arith.constant 0 : index
    %c0_25 = arith.constant 0 : index
    %c0_26 = arith.constant 0 : index
    %15 = vector.load %arg9[%c0_24, %c0_25, %c0_26] : memref<10x10x4xf32, #tpu.memory_space<vmem>>, vector<8x8x4xf32>
    %16 = vector.shape_cast %15 : vector<8x8x4xf32> to vector<64x4xf32>
    %c0_27 = arith.constant 0 : index
    %c0_28 = arith.constant 0 : index
    %c0_29 = arith.constant 0 : index
    %17 = vector.load %arg2[%c0_27, %c0_28, %c0_29] : memref<9x4x8xf32, #tpu.memory_space<vmem>>, vector<1x4x8xf32>
    %18 = vector.shape_cast %17 : vector<1x4x8xf32> to vector<4x8xf32>
    %cst_30 = arith.constant dense<0.000000e+00> : vector<64x8xf32>
    %19 = tpu.matmul %16, %18, %cst_30 {dimension_numbers = #tpu.dot_dimension_numbers<[1], [0], [0], [1], [0, 0, 1, 1], [], []>} : vector<64x4xf32>, vector<4x8xf32>, vector<64x8xf32> -> vector<64x8xf32>
    %20 = arith.addf %14, %19 : vector<64x8xf32>
    %c0_31 = arith.constant 0 : index
    %c1_32 = arith.constant 1 : index
    %c0_33 = arith.constant 0 : index
    %21 = vector.load %arg9[%c0_31, %c1_32, %c0_33] : memref<10x10x4xf32, #tpu.memory_space<vmem>>, vector<8x8x4xf32>
    %22 = vector.shape_cast %21 : vector<8x8x4xf32> to vector<64x4xf32>
    %c1_34 = arith.constant 1 : index
    %c0_35 = arith.constant 0 : index
    %c0_36 = arith.constant 0 : index
    %23 = vector.load %arg2[%c1_34, %c0_35, %c0_36] : memref<9x4x8xf32, #tpu.memory_space<vmem>>, vector<1x4x8xf32>
    %24 = vector.shape_cast %23 : vector<1x4x8xf32> to vector<4x8xf32>
    %cst_37 = arith.constant dense<0.000000e+00> : vector<64x8xf32>
    %25 = tpu.matmul %22, %24, %cst_37 {dimension_numbers = #tpu.dot_dimension_numbers<[1], [0], [0], [1], [0, 0, 1, 1], [], []>} : vector<64x4xf32>, vector<4x8xf32>, vector<64x8xf32> -> vector<64x8xf32>
    %26 = arith.addf %20, %25 : vector<64x8xf32>
    %c0_38 = arith.constant 0 : index
    %c2 = arith.constant 2 : index
    %c0_39 = arith.constant 0 : index
    %27 = vector.load %arg9[%c0_38, %c2, %c0_39] : memref<10x10x4xf32, #tpu.memory_space<vmem>>, vector<8x8x4xf32>
    %28 = vector.shape_cast %27 : vector<8x8x4xf32> to vector<64x4xf32>
    %c2_40 = arith.constant 2 : index
    %c0_41 = arith.constant 0 : index
    %c0_42 = arith.constant 0 : index
    %29 = vector.load %arg2[%c2_40, %c0_41, %c0_42] : memref<9x4x8xf32, #tpu.memory_space<vmem>>, vector<1x4x8xf32>
    %30 = vector.shape_cast %29 : vector<1x4x8xf32> to vector<4x8xf32>
    %cst_43 = arith.constant dense<0.000000e+00> : vector<64x8xf32>
    %31 = tpu.matmul %28, %30, %cst_43 {dimension_numbers = #tpu.dot_dimension_numbers<[1], [0], [0], [1], [0, 0, 1, 1], [], []>} : vector<64x4xf32>, vector<4x8xf32>, vector<64x8xf32> -> vector<64x8xf32>
    %32 = arith.addf %26, %31 : vector<64x8xf32>
    %c1_44 = arith.constant 1 : index
    %c0_45 = arith.constant 0 : index
    %c0_46 = arith.constant 0 : index
    %33 = vector.load %arg9[%c1_44, %c0_45, %c0_46] : memref<10x10x4xf32, #tpu.memory_space<vmem>>, vector<8x8x4xf32>
    %34 = vector.shape_cast %33 : vector<8x8x4xf32> to vector<64x4xf32>
    %c3 = arith.constant 3 : index
    %c0_47 = arith.constant 0 : index
    %c0_48 = arith.constant 0 : index
    %35 = vector.load %arg2[%c3, %c0_47, %c0_48] : memref<9x4x8xf32, #tpu.memory_space<vmem>>, vector<1x4x8xf32>
    %36 = vector.shape_cast %35 : vector<1x4x8xf32> to vector<4x8xf32>
    %cst_49 = arith.constant dense<0.000000e+00> : vector<64x8xf32>
    %37 = tpu.matmul %34, %36, %cst_49 {dimension_numbers = #tpu.dot_dimension_numbers<[1], [0], [0], [1], [0, 0, 1, 1], [], []>} : vector<64x4xf32>, vector<4x8xf32>, vector<64x8xf32> -> vector<64x8xf32>
    %38 = arith.addf %32, %37 : vector<64x8xf32>
    %c1_50 = arith.constant 1 : index
    %c1_51 = arith.constant 1 : index
    %c0_52 = arith.constant 0 : index
    %39 = vector.load %arg9[%c1_50, %c1_51, %c0_52] : memref<10x10x4xf32, #tpu.memory_space<vmem>>, vector<8x8x4xf32>
    %40 = vector.shape_cast %39 : vector<8x8x4xf32> to vector<64x4xf32>
    %c4_53 = arith.constant 4 : index
    %c0_54 = arith.constant 0 : index
    %c0_55 = arith.constant 0 : index
    %41 = vector.load %arg2[%c4_53, %c0_54, %c0_55] : memref<9x4x8xf32, #tpu.memory_space<vmem>>, vector<1x4x8xf32>
    %42 = vector.shape_cast %41 : vector<1x4x8xf32> to vector<4x8xf32>
    %cst_56 = arith.constant dense<0.000000e+00> : vector<64x8xf32>
    %43 = tpu.matmul %40, %42, %cst_56 {dimension_numbers = #tpu.dot_dimension_numbers<[1], [0], [0], [1], [0, 0, 1, 1], [], []>} : vector<64x4xf32>, vector<4x8xf32>, vector<64x8xf32> -> vector<64x8xf32>
    %44 = arith.addf %38, %43 : vector<64x8xf32>
    %c1_57 = arith.constant 1 : index
    %c2_58 = arith.constant 2 : index
    %c0_59 = arith.constant 0 : index
    %45 = vector.load %arg9[%c1_57, %c2_58, %c0_59] : memref<10x10x4xf32, #tpu.memory_space<vmem>>, vector<8x8x4xf32>
    %46 = vector.shape_cast %45 : vector<8x8x4xf32> to vector<64x4xf32>
    %c5 = arith.constant 5 : index
    %c0_60 = arith.constant 0 : index
    %c0_61 = arith.constant 0 : index
    %47 = vector.load %arg2[%c5, %c0_60, %c0_61] : memref<9x4x8xf32, #tpu.memory_space<vmem>>, vector<1x4x8xf32>
    %48 = vector.shape_cast %47 : vector<1x4x8xf32> to vector<4x8xf32>
    %cst_62 = arith.constant dense<0.000000e+00> : vector<64x8xf32>
    %49 = tpu.matmul %46, %48, %cst_62 {dimension_numbers = #tpu.dot_dimension_numbers<[1], [0], [0], [1], [0, 0, 1, 1], [], []>} : vector<64x4xf32>, vector<4x8xf32>, vector<64x8xf32> -> vector<64x8xf32>
    %50 = arith.addf %44, %49 : vector<64x8xf32>
    %c2_63 = arith.constant 2 : index
    %c0_64 = arith.constant 0 : index
    %c0_65 = arith.constant 0 : index
    %51 = vector.load %arg9[%c2_63, %c0_64, %c0_65] : memref<10x10x4xf32, #tpu.memory_space<vmem>>, vector<8x8x4xf32>
    %52 = vector.shape_cast %51 : vector<8x8x4xf32> to vector<64x4xf32>
    %c6 = arith.constant 6 : index
    %c0_66 = arith.constant 0 : index
    %c0_67 = arith.constant 0 : index
    %53 = vector.load %arg2[%c6, %c0_66, %c0_67] : memref<9x4x8xf32, #tpu.memory_space<vmem>>, vector<1x4x8xf32>
    %54 = vector.shape_cast %53 : vector<1x4x8xf32> to vector<4x8xf32>
    %cst_68 = arith.constant dense<0.000000e+00> : vector<64x8xf32>
    %55 = tpu.matmul %52, %54, %cst_68 {dimension_numbers = #tpu.dot_dimension_numbers<[1], [0], [0], [1], [0, 0, 1, 1], [], []>} : vector<64x4xf32>, vector<4x8xf32>, vector<64x8xf32> -> vector<64x8xf32>
    %56 = arith.addf %50, %55 : vector<64x8xf32>
    %c2_69 = arith.constant 2 : index
    %c1_70 = arith.constant 1 : index
    %c0_71 = arith.constant 0 : index
    %57 = vector.load %arg9[%c2_69, %c1_70, %c0_71] : memref<10x10x4xf32, #tpu.memory_space<vmem>>, vector<8x8x4xf32>
    %58 = vector.shape_cast %57 : vector<8x8x4xf32> to vector<64x4xf32>
    %c7 = arith.constant 7 : index
    %c0_72 = arith.constant 0 : index
    %c0_73 = arith.constant 0 : index
    %59 = vector.load %arg2[%c7, %c0_72, %c0_73] : memref<9x4x8xf32, #tpu.memory_space<vmem>>, vector<1x4x8xf32>
    %60 = vector.shape_cast %59 : vector<1x4x8xf32> to vector<4x8xf32>
    %cst_74 = arith.constant dense<0.000000e+00> : vector<64x8xf32>
    %61 = tpu.matmul %58, %60, %cst_74 {dimension_numbers = #tpu.dot_dimension_numbers<[1], [0], [0], [1], [0, 0, 1, 1], [], []>} : vector<64x4xf32>, vector<4x8xf32>, vector<64x8xf32> -> vector<64x8xf32>
    %62 = arith.addf %56, %61 : vector<64x8xf32>
    %c2_75 = arith.constant 2 : index
    %c2_76 = arith.constant 2 : index
    %c0_77 = arith.constant 0 : index
    %63 = vector.load %arg9[%c2_75, %c2_76, %c0_77] : memref<10x10x4xf32, #tpu.memory_space<vmem>>, vector<8x8x4xf32>
    %64 = vector.shape_cast %63 : vector<8x8x4xf32> to vector<64x4xf32>
    %c8 = arith.constant 8 : index
    %c0_78 = arith.constant 0 : index
    %c0_79 = arith.constant 0 : index
    %65 = vector.load %arg2[%c8, %c0_78, %c0_79] : memref<9x4x8xf32, #tpu.memory_space<vmem>>, vector<1x4x8xf32>
    %66 = vector.shape_cast %65 : vector<1x4x8xf32> to vector<4x8xf32>
    %cst_80 = arith.constant dense<0.000000e+00> : vector<64x8xf32>
    %67 = tpu.matmul %64, %66, %cst_80 {dimension_numbers = #tpu.dot_dimension_numbers<[1], [0], [0], [1], [0, 0, 1, 1], [], []>} : vector<64x4xf32>, vector<4x8xf32>, vector<64x8xf32> -> vector<64x8xf32>
    %68 = arith.addf %62, %67 : vector<64x8xf32>
    %c0_81 = arith.constant 0 : index
    %c0_82 = arith.constant 0 : index
    %69 = vector.load %arg3[%c0_81, %c0_82] : memref<1x8xf32, #tpu.memory_space<vmem>>, vector<1x8xf32>
    %70 = vector.broadcast %69 : vector<1x8xf32> to vector<64x8xf32>
    %71 = arith.mulf %68, %70 : vector<64x8xf32>
    %c0_83 = arith.constant 0 : index
    %c0_84 = arith.constant 0 : index
    %72 = vector.load %arg4[%c0_83, %c0_84] : memref<1x8xf32, #tpu.memory_space<vmem>>, vector<1x8xf32>
    %73 = vector.broadcast %72 : vector<1x8xf32> to vector<64x8xf32>
    %74 = arith.addf %71, %73 : vector<64x8xf32>
    %cst_85 = arith.constant 0.000000e+00 : f32
    %75 = vector.broadcast %cst_85 : f32 to vector<64x8xf32>
    %76 = arith.maximumf %74, %75 : vector<64x8xf32>
    %77 = vector.shape_cast %76 : vector<64x8xf32> to vector<8x8x8xf32>
    %cst_86 = arith.constant 0.000000e+00 : f32
    %78 = vector.broadcast %cst_86 : f32 to vector<10x10x8xf32>
    %c0_87 = arith.constant 0 : index
    %c0_88 = arith.constant 0 : index
    %c0_89 = arith.constant 0 : index
    %79 = vector.load %arg10[%c0_87, %c0_88, %c0_89] : memref<10x10x8xf32, #tpu.memory_space<vmem>>, vector<10x10x8xf32>
    tpu.vector_store %arg10[%c0_87, %c0_88, %c0_89], %78 {strides = array<i32>} : memref<10x10x8xf32, #tpu.memory_space<vmem>>, vector<10x10x8xf32>,
    %c1_90 = arith.constant 1 : index
    %c1_91 = arith.constant 1 : index
    %c0_92 = arith.constant 0 : index
    %80 = vector.load %arg10[%c1_90, %c1_91, %c0_92] : memref<10x10x8xf32, #tpu.memory_space<vmem>>, vector<8x8x8xf32>
    tpu.vector_store %arg10[%c1_90, %c1_91, %c0_92], %77 {strides = array<i32>} : memref<10x10x8xf32, #tpu.memory_space<vmem>>, vector<8x8x8xf32>,
    %cst_93 = arith.constant 0.000000e+00 : f32
    %81 = vector.broadcast %cst_93 : f32 to vector<8x64xf32>
    %c0_94 = arith.constant 0 : index
    %c0_95 = arith.constant 0 : index
    %c0_96 = arith.constant 0 : index
    %82 = vector.load %arg10[%c0_94, %c0_95, %c0_96] : memref<10x10x8xf32, #tpu.memory_space<vmem>>, vector<8x8x8xf32>
    %83 = vector.shape_cast %82 : vector<8x8x8xf32> to vector<64x8xf32>
    %c0_97 = arith.constant 0 : index
    %c0_98 = arith.constant 0 : index
    %c0_99 = arith.constant 0 : index
    %84 = vector.load %arg5[%c0_97, %c0_98, %c0_99] : memref<9x8x8xf32, #tpu.memory_space<vmem>>, vector<1x8x8xf32>
    %85 = vector.shape_cast %84 : vector<1x8x8xf32> to vector<8x8xf32>
    "tpu.trace_start"() <{level = 10 : i32, message = "oc,pc->op"}> : () -> ()
    %cst_100 = arith.constant dense<0.000000e+00> : vector<8x64xf32>
    %86 = tpu.matmul %85, %83, %cst_100 {dimension_numbers = #tpu.dot_dimension_numbers<[1], [1], [0], [0], [0, 0, 1, 0], [], []>} : vector<8x8xf32>, vector<64x8xf32>, vector<8x64xf32> -> vector<8x64xf32>
    "tpu.trace_stop"() : () -> ()
    %87 = arith.addf %81, %86 : vector<8x64xf32>
    %c0_101 = arith.constant 0 : index
    %c1_102 = arith.constant 1 : index
    %c0_103 = arith.constant 0 : index
    %88 = vector.load %arg10[%c0_101, %c1_102, %c0_103] : memref<10x10x8xf32, #tpu.memory_space<vmem>>, vector<8x8x8xf32>
    %89 = vector.shape_cast %88 : vector<8x8x8xf32> to vector<64x8xf32>
    %c1_104 = arith.constant 1 : index
    %c0_105 = arith.constant 0 : index
    %c0_106 = arith.constant 0 : index
    %90 = vector.load %arg5[%c1_104, %c0_105, %c0_106] : memref<9x8x8xf32, #tpu.memory_space<vmem>>, vector<1x8x8xf32>
    %91 = vector.shape_cast %90 : vector<1x8x8xf32> to vector<8x8xf32>
    "tpu.trace_start"() <{level = 10 : i32, message = "oc,pc->op"}> : () -> ()
    %cst_107 = arith.constant dense<0.000000e+00> : vector<8x64xf32>
    %92 = tpu.matmul %91, %89, %cst_107 {dimension_numbers = #tpu.dot_dimension_numbers<[1], [1], [0], [0], [0, 0, 1, 0], [], []>} : vector<8x8xf32>, vector<64x8xf32>, vector<8x64xf32> -> vector<8x64xf32>
    "tpu.trace_stop"() : () -> ()
    %93 = arith.addf %87, %92 : vector<8x64xf32>
    %c0_108 = arith.constant 0 : index
    %c2_109 = arith.constant 2 : index
    %c0_110 = arith.constant 0 : index
    %94 = vector.load %arg10[%c0_108, %c2_109, %c0_110] : memref<10x10x8xf32, #tpu.memory_space<vmem>>, vector<8x8x8xf32>
    %95 = vector.shape_cast %94 : vector<8x8x8xf32> to vector<64x8xf32>
    %c2_111 = arith.constant 2 : index
    %c0_112 = arith.constant 0 : index
    %c0_113 = arith.constant 0 : index
    %96 = vector.load %arg5[%c2_111, %c0_112, %c0_113] : memref<9x8x8xf32, #tpu.memory_space<vmem>>, vector<1x8x8xf32>
    %97 = vector.shape_cast %96 : vector<1x8x8xf32> to vector<8x8xf32>
    "tpu.trace_start"() <{level = 10 : i32, message = "oc,pc->op"}> : () -> ()
    %cst_114 = arith.constant dense<0.000000e+00> : vector<8x64xf32>
    %98 = tpu.matmul %97, %95, %cst_114 {dimension_numbers = #tpu.dot_dimension_numbers<[1], [1], [0], [0], [0, 0, 1, 0], [], []>} : vector<8x8xf32>, vector<64x8xf32>, vector<8x64xf32> -> vector<8x64xf32>
    "tpu.trace_stop"() : () -> ()
    %99 = arith.addf %93, %98 : vector<8x64xf32>
    %c1_115 = arith.constant 1 : index
    %c0_116 = arith.constant 0 : index
    %c0_117 = arith.constant 0 : index
    %100 = vector.load %arg10[%c1_115, %c0_116, %c0_117] : memref<10x10x8xf32, #tpu.memory_space<vmem>>, vector<8x8x8xf32>
    %101 = vector.shape_cast %100 : vector<8x8x8xf32> to vector<64x8xf32>
    %c3_118 = arith.constant 3 : index
    %c0_119 = arith.constant 0 : index
    %c0_120 = arith.constant 0 : index
    %102 = vector.load %arg5[%c3_118, %c0_119, %c0_120] : memref<9x8x8xf32, #tpu.memory_space<vmem>>, vector<1x8x8xf32>
    %103 = vector.shape_cast %102 : vector<1x8x8xf32> to vector<8x8xf32>
    "tpu.trace_start"() <{level = 10 : i32, message = "oc,pc->op"}> : () -> ()
    %cst_121 = arith.constant dense<0.000000e+00> : vector<8x64xf32>
    %104 = tpu.matmul %103, %101, %cst_121 {dimension_numbers = #tpu.dot_dimension_numbers<[1], [1], [0], [0], [0, 0, 1, 0], [], []>} : vector<8x8xf32>, vector<64x8xf32>, vector<8x64xf32> -> vector<8x64xf32>
    "tpu.trace_stop"() : () -> ()
    %105 = arith.addf %99, %104 : vector<8x64xf32>
    %c1_122 = arith.constant 1 : index
    %c1_123 = arith.constant 1 : index
    %c0_124 = arith.constant 0 : index
    %106 = vector.load %arg10[%c1_122, %c1_123, %c0_124] : memref<10x10x8xf32, #tpu.memory_space<vmem>>, vector<8x8x8xf32>
    %107 = vector.shape_cast %106 : vector<8x8x8xf32> to vector<64x8xf32>
    %c4_125 = arith.constant 4 : index
    %c0_126 = arith.constant 0 : index
    %c0_127 = arith.constant 0 : index
    %108 = vector.load %arg5[%c4_125, %c0_126, %c0_127] : memref<9x8x8xf32, #tpu.memory_space<vmem>>, vector<1x8x8xf32>
    %109 = vector.shape_cast %108 : vector<1x8x8xf32> to vector<8x8xf32>
    "tpu.trace_start"() <{level = 10 : i32, message = "oc,pc->op"}> : () -> ()
    %cst_128 = arith.constant dense<0.000000e+00> : vector<8x64xf32>
    %110 = tpu.matmul %109, %107, %cst_128 {dimension_numbers = #tpu.dot_dimension_numbers<[1], [1], [0], [0], [0, 0, 1, 0], [], []>} : vector<8x8xf32>, vector<64x8xf32>, vector<8x64xf32> -> vector<8x64xf32>
    "tpu.trace_stop"() : () -> ()
    %111 = arith.addf %105, %110 : vector<8x64xf32>
    %c1_129 = arith.constant 1 : index
    %c2_130 = arith.constant 2 : index
    %c0_131 = arith.constant 0 : index
    %112 = vector.load %arg10[%c1_129, %c2_130, %c0_131] : memref<10x10x8xf32, #tpu.memory_space<vmem>>, vector<8x8x8xf32>
    %113 = vector.shape_cast %112 : vector<8x8x8xf32> to vector<64x8xf32>
    %c5_132 = arith.constant 5 : index
    %c0_133 = arith.constant 0 : index
    %c0_134 = arith.constant 0 : index
    %114 = vector.load %arg5[%c5_132, %c0_133, %c0_134] : memref<9x8x8xf32, #tpu.memory_space<vmem>>, vector<1x8x8xf32>
    %115 = vector.shape_cast %114 : vector<1x8x8xf32> to vector<8x8xf32>
    "tpu.trace_start"() <{level = 10 : i32, message = "oc,pc->op"}> : () -> ()
    %cst_135 = arith.constant dense<0.000000e+00> : vector<8x64xf32>
    %116 = tpu.matmul %115, %113, %cst_135 {dimension_numbers = #tpu.dot_dimension_numbers<[1], [1], [0], [0], [0, 0, 1, 0], [], []>} : vector<8x8xf32>, vector<64x8xf32>, vector<8x64xf32> -> vector<8x64xf32>
    "tpu.trace_stop"() : () -> ()
    %117 = arith.addf %111, %116 : vector<8x64xf32>
    %c2_136 = arith.constant 2 : index
    %c0_137 = arith.constant 0 : index
    %c0_138 = arith.constant 0 : index
    %118 = vector.load %arg10[%c2_136, %c0_137, %c0_138] : memref<10x10x8xf32, #tpu.memory_space<vmem>>, vector<8x8x8xf32>
    %119 = vector.shape_cast %118 : vector<8x8x8xf32> to vector<64x8xf32>
    %c6_139 = arith.constant 6 : index
    %c0_140 = arith.constant 0 : index
    %c0_141 = arith.constant 0 : index
    %120 = vector.load %arg5[%c6_139, %c0_140, %c0_141] : memref<9x8x8xf32, #tpu.memory_space<vmem>>, vector<1x8x8xf32>
    %121 = vector.shape_cast %120 : vector<1x8x8xf32> to vector<8x8xf32>
    "tpu.trace_start"() <{level = 10 : i32, message = "oc,pc->op"}> : () -> ()
    %cst_142 = arith.constant dense<0.000000e+00> : vector<8x64xf32>
    %122 = tpu.matmul %121, %119, %cst_142 {dimension_numbers = #tpu.dot_dimension_numbers<[1], [1], [0], [0], [0, 0, 1, 0], [], []>} : vector<8x8xf32>, vector<64x8xf32>, vector<8x64xf32> -> vector<8x64xf32>
    "tpu.trace_stop"() : () -> ()
    %123 = arith.addf %117, %122 : vector<8x64xf32>
    %c2_143 = arith.constant 2 : index
    %c1_144 = arith.constant 1 : index
    %c0_145 = arith.constant 0 : index
    %124 = vector.load %arg10[%c2_143, %c1_144, %c0_145] : memref<10x10x8xf32, #tpu.memory_space<vmem>>, vector<8x8x8xf32>
    %125 = vector.shape_cast %124 : vector<8x8x8xf32> to vector<64x8xf32>
    %c7_146 = arith.constant 7 : index
    %c0_147 = arith.constant 0 : index
    %c0_148 = arith.constant 0 : index
    %126 = vector.load %arg5[%c7_146, %c0_147, %c0_148] : memref<9x8x8xf32, #tpu.memory_space<vmem>>, vector<1x8x8xf32>
    %127 = vector.shape_cast %126 : vector<1x8x8xf32> to vector<8x8xf32>
    "tpu.trace_start"() <{level = 10 : i32, message = "oc,pc->op"}> : () -> ()
    %cst_149 = arith.constant dense<0.000000e+00> : vector<8x64xf32>
    %128 = tpu.matmul %127, %125, %cst_149 {dimension_numbers = #tpu.dot_dimension_numbers<[1], [1], [0], [0], [0, 0, 1, 0], [], []>} : vector<8x8xf32>, vector<64x8xf32>, vector<8x64xf32> -> vector<8x64xf32>
    "tpu.trace_stop"() : () -> ()
    %129 = arith.addf %123, %128 : vector<8x64xf32>
    %c2_150 = arith.constant 2 : index
    %c2_151 = arith.constant 2 : index
    %c0_152 = arith.constant 0 : index
    %130 = vector.load %arg10[%c2_150, %c2_151, %c0_152] : memref<10x10x8xf32, #tpu.memory_space<vmem>>, vector<8x8x8xf32>
    %131 = vector.shape_cast %130 : vector<8x8x8xf32> to vector<64x8xf32>
    %c8_153 = arith.constant 8 : index
    %c0_154 = arith.constant 0 : index
    %c0_155 = arith.constant 0 : index
    %132 = vector.load %arg5[%c8_153, %c0_154, %c0_155] : memref<9x8x8xf32, #tpu.memory_space<vmem>>, vector<1x8x8xf32>
    %133 = vector.shape_cast %132 : vector<1x8x8xf32> to vector<8x8xf32>
    "tpu.trace_start"() <{level = 10 : i32, message = "oc,pc->op"}> : () -> ()
    %cst_156 = arith.constant dense<0.000000e+00> : vector<8x64xf32>
    %134 = tpu.matmul %133, %131, %cst_156 {dimension_numbers = #tpu.dot_dimension_numbers<[1], [1], [0], [0], [0, 0, 1, 0], [], []>} : vector<8x8xf32>, vector<64x8xf32>, vector<8x64xf32> -> vector<8x64xf32>
    "tpu.trace_stop"() : () -> ()
    %135 = arith.addf %129, %134 : vector<8x64xf32>
    %c0_157 = arith.constant 0 : index
    %c0_158 = arith.constant 0 : index
    %136 = vector.load %arg6[%c0_157, %c0_158] : memref<8x1xf32, #tpu.memory_space<vmem>>, vector<8x1xf32>
    %137 = vector.broadcast %136 : vector<8x1xf32> to vector<8x64xf32>
    %138 = arith.mulf %135, %137 : vector<8x64xf32>
    %c0_159 = arith.constant 0 : index
    %c0_160 = arith.constant 0 : index
    %139 = vector.load %arg7[%c0_159, %c0_160] : memref<8x1xf32, #tpu.memory_space<vmem>>, vector<8x1xf32>
    %140 = vector.broadcast %139 : vector<8x1xf32> to vector<8x64xf32>
    %141 = arith.addf %138, %140 : vector<8x64xf32>
    %cst_161 = arith.constant 0.000000e+00 : f32
    %142 = vector.broadcast %cst_161 : f32 to vector<8x64xf32>
    %143 = arith.maximumf %141, %142 : vector<8x64xf32>
    %c0_162 = arith.constant 0 : index
    %c0_163 = arith.constant 0 : index
    %c0_164 = arith.constant 0 : index
    %144 = vector.load %arg8[%c0_162, %c0_163, %c0_164] : memref<1x8x64xf32, #tpu.memory_space<vmem>>, vector<1x8x64xf32>
    %145 = vector.shape_cast %144 : vector<1x8x64xf32> to vector<8x64xf32>
    %146 = vector.shape_cast %143 : vector<8x64xf32> to vector<1x8x64xf32>
    tpu.vector_store %arg8[%c0_162, %c0_163, %c0_164], %146 {strides = array<i32>} : memref<1x8x64xf32, #tpu.memory_space<vmem>>, vector<1x8x64xf32>,
    return
  }
  func.func @transform_0(%arg0: i32) -> (i32, i32, i32, i32, i32) {
    %c0_i32 = arith.constant 0 : i32
    %c0_i32_0 = arith.constant 0 : i32
    %c0_i32_1 = arith.constant 0 : i32
    %c0_i32_2 = arith.constant 0 : i32
    %c0_i32_3 = arith.constant 0 : i32
    return %arg0, %c0_i32, %c0_i32_0, %c0_i32_1, %c0_i32_2 : i32, i32, i32, i32, i32
  }
  func.func @transform_1(%arg0: i32) -> (i32, i32, i32) {
    %c0_i32 = arith.constant 0 : i32
    %c0_i32_0 = arith.constant 0 : i32
    %c0_i32_1 = arith.constant 0 : i32
    %c0_i32_2 = arith.constant 0 : i32
    return %c0_i32, %c0_i32_0, %c0_i32_1 : i32, i32, i32
  }
  func.func @transform_2(%arg0: i32) -> (i32, i32) {
    %c0_i32 = arith.constant 0 : i32
    %c0_i32_0 = arith.constant 0 : i32
    %c0_i32_1 = arith.constant 0 : i32
    return %c0_i32, %c0_i32_0 : i32, i32
  }
  func.func @transform_3(%arg0: i32) -> (i32, i32) {
    %c0_i32 = arith.constant 0 : i32
    %c0_i32_0 = arith.constant 0 : i32
    %c0_i32_1 = arith.constant 0 : i32
    return %c0_i32, %c0_i32_0 : i32, i32
  }
  func.func @transform_4(%arg0: i32) -> (i32, i32, i32) {
    %c0_i32 = arith.constant 0 : i32
    %c0_i32_0 = arith.constant 0 : i32
    %c0_i32_1 = arith.constant 0 : i32
    %c0_i32_2 = arith.constant 0 : i32
    return %c0_i32, %c0_i32_0, %c0_i32_1 : i32, i32, i32
  }
  func.func @transform_5(%arg0: i32) -> (i32, i32) {
    %c0_i32 = arith.constant 0 : i32
    %c0_i32_0 = arith.constant 0 : i32
    %c0_i32_1 = arith.constant 0 : i32
    return %c0_i32, %c0_i32_0 : i32, i32
  }
  func.func @transform_6(%arg0: i32) -> (i32, i32) {
    %c0_i32 = arith.constant 0 : i32
    %c0_i32_0 = arith.constant 0 : i32
    %c0_i32_1 = arith.constant 0 : i32
    return %c0_i32, %c0_i32_0 : i32, i32
  }
  func.func @transform_7(%arg0: i32) -> (i32, i32, i32) {
    %c0_i32 = arith.constant 0 : i32
    %c0_i32_0 = arith.constant 0 : i32
    %c0_i32_1 = arith.constant 0 : i32
    return %arg0, %c0_i32, %c0_i32_0 : i32, i32, i32
  }
}

</mosaic_0001>

<bundles_post_ra>
// kernel: down_block_forward.1
= control target key start
LH: loop header
LB: loop body
LE: loop exit
PB: predicated region body
PF: predicated region fallthrough
CT: control target
= control target key end

     0   :  { %s2092_s24 = smov 0   ;;  %s2793_s0 = inlined_call_operand.vmem [shape: f32[2,8,2,8,8], index: 0, kind: input, shape index: {}]   ;;  %s2794_s1 = inlined_call_operand.vmem [shape: f32[9,4,8], index: 1, kind: input, shape index: {}]   ;;  %s2795_s2 = inlined_call_operand.vmem [shape: f32[1,8], index: 2, kind: input, shape index: {}]   ;;  %s2796_s3 = inlined_call_operand.vmem [shape: f32[1,8], index: 3, kind: input, shape index: {}]   ;;  %s2797_s4 = inlined_call_operand.vmem [shape: f32[9,8,8], index: 4, kind: input, shape index: {}]   ;;  %s2798_s5 = inlined_call_operand.vmem [shape: f32[8,1], index: 5, kind: input, shape index: {}]   ;;  %s2799_s6 = inlined_call_operand.vmem [shape: f32[8,1], index: 6, kind: input, shape index: {}]   ;;  %s2800_s7 = inlined_call_operand.vmem [shape: f32[2,8,64], index: 7, kind: output, shape index: {}]  }
   0x1 LB: > { %s1825_s25 = sadd.s32 4294967295, %s2047_s24   ;;  %p1829_p0 = scmp.ge.s32.totalorder %s2047_s24, 1  ;;  %s2047_s24 = sphi %s2092_s24, %s17_s24  }
   0x2   : > { %p237_p1 = scmp.lt.s32.totalorder %s2047_s24, 3 }
   0x4   : > { %p238_p2 = pnand %p1829_p0, %p237_p1 }
   0x5   : > { %p268_p3 = scmp.lt.s32.totalorder (!%p238_p2), %s1825_s25, 1  ;;  %s2049_s30 = smov (!%p238_p2), 124  }
   0x6   : > { %241 = sbr.rel (%p238_p2) target bundleno = 690 (0x2b2), region = 48 }
   0xb   : > { %s2802_s25 = smov (!%p268_p3, %s1825_s25), 1  ;;  %vm382_vm0 = vcmask 31744   ;;  %vm456_vm1 = vcmask 1043456   ;;  %v2189_v16 = vld [vmem:[%s2794_s1 + $0x8] sm:$0xf]  ;;  %vm384_vm2 = vcmask 25600  }
   0xc   : > { %s2021_s26 = sshll.u32 %s2802_s25, 7  ;;  %v2050_v17 = vmov 0.0   ;;  %1861 = vmatpush.msk.msra.mxu2 %vm456_vm1, %v2189_v16  ;;  %v1841_v19 = vld [vmem:[%s2794_s1 + $0x4] sm:$0xf]  ;;  %v421_v20 = vld [vmem:[%s2794_s1] sm:$0xf] }
   0xd   : > { %s2106_s29 = scalar_lea.vmem %s2793_s0, %s2021_s26  ;;  %388 = vst.msk [vmem:[#allocation2 + $0x20] sm:$0xff] %vm382_vm0, %v2050_v17  ;;  %1842 = vmatpush.msk.msra.mxu0 %vm456_vm1, %v1841_v19  ;;  %1851 = vmatpush.msk.msra.mxu1 %vm456_vm1, %v421_v20  ;;  %v1880_v38 = vld [vmem:[%s2794_s1 + $0x10] sm:$0xf]  ;;  %v1890_v61 = vld [vmem:[%s2794_s1 + $0x14] sm:$0xf]  ;;  %vm1204_vm3 = vcmask 64512  }
   0xe   : > { %v2109_v0 = vld [vmem:[%s2106_s29 + $0x10] sm:$0xff]  ;;  %v2112_v1 = vld [vmem:[%s2106_s29] sm:$0xff]  ;;  %v2124_v3 = vld [vmem:[%s2106_s29 + $0x18] sm:$0xff]  ;;  %389 = vst.msk [vmem:[#allocation2 + $0x28] sm:$0x3] %vm384_vm2, %v2050_v17  ;;  %2022 = vmatpush.msk.msra.mxu3 %vm456_vm1, %v1841_v19  ;;  %vm1206_vm4 = vcmask 58368  }
   0xf   : > { %304 = vrot.lane.b32.xlu1 %v2109_v0, %s2049_s30  ;;  %302 = vrot.lane.b32.xlu0 %v2112_v1, %s2049_s30  ;;  %v2119_v2 = vld [vmem:[%s2106_s29 + $0x20] sm:$0xff]  ;;  %v2127_v4 = vld [vmem:[%s2106_s29 + $0x8] sm:$0xff]  ;;  %383 = vst.msk [vmem:[#allocation2] sm:$0xff] %vm382_vm0, %v2050_v17  ;;  %s1832_s10 = sshll.u32 %s2802_s25, 3  ;;  %vm1770_vm5 = vcmask 523264  }
  0x10   : > { %306 = vrot.lane.b32.xlu2 %v2119_v2, %s2049_s30  ;;  %v2130_v5 = vld [vmem:[%s2106_s29 + $0x60] sm:$0xff]  ;;  %v2139_v6 = vld [vmem:[%s2106_s29 + $0x68] sm:$0xff]  ;;  %v2145_v8 = vld [vmem:[%s2106_s29 + $0x30] sm:$0xff]  ;;  %385 = vst.msk [vmem:[#allocation2 + $0x8] sm:$0x3] %vm384_vm2, %v2050_v17  ;;  %2023 = vmatpush.msk.msrb.mxu3 %vm456_vm1, %v421_v20  ;;  %s276_s13 = scalar_lea.vmem %s2800_s7, %s1832_s10 }
  0x11   : > { %v2142_v7 = vld [vmem:[%s2106_s29 + $0x28] sm:$0xff]  ;;  %v2154_v9 = vld [vmem:[%s2106_s29 + $0x38] sm:$0xff]  ;;  %v2157_v10 = vld [vmem:[%s2106_s29 + $0x40] sm:$0xff]  ;;  %386 = vst.msk [vmem:[#allocation2 + $0x10] sm:$0xff] %vm382_vm0, %v2050_v17  ;;  %1881 = vmatpush.msk.msrb.mxu0 %vm456_vm1, %v1880_v38  ;;  %1891 = vmatpush.msk.msrb.mxu1 %vm456_vm1, %v1890_v61 }
  0x12   : > { %v2160_v11 = vld [vmem:[%s2106_s29 + $0x48] sm:$0xff]  ;;  %v2169_v12 = vld [vmem:[%s2106_s29 + $0x58] sm:$0xff]  ;;  %v2172_v13 = vld [vmem:[%s2106_s29 + $0x50] sm:$0xff]  ;;  %387 = vst.msk [vmem:[#allocation2 + $0x18] sm:$0x3] %vm384_vm2, %v2050_v17 }
  0x13   : > { %v2179_v14 = vld [vmem:[%s2106_s29 + $0x78] sm:$0xff]  ;;  %v2184_v15 = vld [vmem:[%s2106_s29 + $0x70] sm:$0xff]  ;;  %390 = vst.msk [vmem:[#allocation2 + $0x30] sm:$0xff] %vm382_vm0, %v2050_v17 }
  0x14   : > { %391 = vst.msk [vmem:[#allocation2 + $0x38] sm:$0x3] %vm384_vm2, %v2050_v17  ;;  %v1900_v62 = vld [vmem:[%s2794_s1 + $0x18] sm:$0xf] }
  0x15   : > { %392 = vst.msk [vmem:[#allocation2 + $0x40] sm:$0xff] %vm382_vm0, %v2050_v17  ;;  %1901 = vmatpush.msk.msrb.mxu2 %vm456_vm1, %v1900_v62 }
  0x16   : > { %393 = vst.msk [vmem:[#allocation2 + $0x48] sm:$0x3] %vm384_vm2, %v2050_v17  ;;  %v413_v22 = vld [vmem:[#allocation2] sm:$0xff] }
  0x17   : > { %344 = vrot.lane.b32.xlu1 %v2124_v3, %s2049_s30  ;;  %342 = vrot.lane.b32.xlu0 %v2127_v4, %s2049_s30  ;;  %394 = vst.msk [vmem:[#allocation2 + $0x50] sm:$0xff] %vm382_vm0, %v2050_v17  ;;  %v569_v18 = vld [vmem:[#allocation2 + $0x2] sm:$0xff] }
  0x18   : > { %314 = vrot.lane.b32.xlu2 %v2130_v5, %s2049_s30  ;;  %395 = vst.msk [vmem:[#allocation2 + $0x58] sm:$0x3] %vm384_vm2, %v2050_v17  ;;  %1862 = vmatmul.msk.f32.vlgmr.msra.gmra.mxu2 %vm382_vm0, %v569_v18  ;;  %v422_v21 = vld [vmem:[#allocation2 + $0x1] sm:$0xff] }
  0x19   : > { %396 = vst.msk [vmem:[#allocation2 + $0x60] sm:$0xff] %vm382_vm0, %v2050_v17  ;;  %1843 = vmatmul.msk.f32.vlgmr.msra.gmra.mxu0 %vm382_vm0, %v422_v21  ;;  %1852 = vmatmul.msk.f32.vlgmr.msra.gmra.mxu1 %vm382_vm0, %v413_v22  ;;  %v1910_v22 = vld [vmem:[%s2794_s1 + $0x1c] sm:$0xf] }
  0x1a   : > { %397 = vst.msk [vmem:[#allocation2 + $0x68] sm:$0x3] %vm384_vm2, %v2050_v17 }
  0x1b   : > { %398 = vst.msk [vmem:[#allocation2 + $0x70] sm:$0xff] %vm382_vm0, %v2050_v17 }
  0x1c   : > { %399 = vst.msk [vmem:[#allocation2 + $0x78] sm:$0x3] %vm384_vm2, %v2050_v17 }
  0x1d   : > { %400 = vst.msk [vmem:[#allocation2 + $0x80] sm:$0xff] %vm382_vm0, %v2050_v17 }
  0x1e   : > { %401 = vst.msk [vmem:[#allocation2 + $0x88] sm:$0x3] %vm384_vm2, %v2050_v17 }
  0x1f   : > { %354 = vrot.lane.b32.xlu1 %v2139_v6, %s2049_s30  ;;  %346 = vrot.lane.b32.xlu0 %v2142_v7, %s2049_s30  ;;  %402 = vst.msk [vmem:[#allocation2 + $0x90] sm:$0xff] %vm382_vm0, %v2050_v17 }
  0x20   : > { %308 = vrot.lane.b32.xlu2 %v2145_v8, %s2049_s30  ;;  %403 = vst.msk [vmem:[#allocation2 + $0x98] sm:$0x3] %vm384_vm2, %v2050_v17 }
  0x21   : > { %1208 = vst.msk [vmem:[#allocation3 + $0x10] sm:$0xff] %vm1204_vm3, %v2050_v17 }
  0x22   : > { %1209 = vst.msk [vmem:[#allocation3 + $0x18] sm:$0x3] %vm1206_vm4, %v2050_v17 }
  0x23   : > { %1205 = vst.msk [vmem:[#allocation3] sm:$0xff] %vm1204_vm3, %v2050_v17 }
  0x24   : > { %1207 = vst.msk [vmem:[#allocation3 + $0x8] sm:$0x3] %vm1206_vm4, %v2050_v17 }
  0x25   : > { %1210 = vst.msk [vmem:[#allocation3 + $0x20] sm:$0xff] %vm1204_vm3, %v2050_v17 }
  0x26   : > { %1211 = vst.msk [vmem:[#allocation3 + $0x28] sm:$0x3] %vm1206_vm4, %v2050_v17 }
  0x27   : > { %348 = vrot.lane.b32.xlu0 %v2154_v9, %s2049_s30  ;;  %310 = vrot.lane.b32.xlu1 %v2157_v10, %s2049_s30  ;;  %1212 = vst.msk [vmem:[#allocation3 + $0x30] sm:$0xff] %vm1204_vm3, %v2050_v17 }
  0x28   : > { %350 = vrot.lane.b32.xlu2 %v2160_v11, %s2049_s30  ;;  %1213 = vst.msk [vmem:[#allocation3 + $0x38] sm:$0x3] %vm1206_vm4, %v2050_v17 }
  0x29   : > { %1214 = vst.msk [vmem:[#allocation3 + $0x40] sm:$0xff] %vm1204_vm3, %v2050_v17 }
  0x2a   : > { %1215 = vst.msk [vmem:[#allocation3 + $0x48] sm:$0x3] %vm1206_vm4, %v2050_v17 }
  0x2b   : > { %1216 = vst.msk [vmem:[#allocation3 + $0x50] sm:$0xff] %vm1204_vm3, %v2050_v17 }
  0x2c   : > { %1217 = vst.msk [vmem:[#allocation3 + $0x58] sm:$0x3] %vm1206_vm4, %v2050_v17 }
  0x2d   : > { %1218 = vst.msk [vmem:[#allocation3 + $0x60] sm:$0xff] %vm1204_vm3, %v2050_v17 }
  0x2e   : > { %1219 = vst.msk [vmem:[#allocation3 + $0x68] sm:$0x3] %vm1206_vm4, %v2050_v17 }
  0x2f   : > { %352 = vrot.lane.b32.xlu1 %v2169_v12, %s2049_s30  ;;  %312 = vrot.lane.b32.xlu0 %v2172_v13, %s2049_s30  ;;  %1220 = vst.msk [vmem:[#allocation3 + $0x70] sm:$0xff] %vm1204_vm3, %v2050_v17 }
  0x30   : > { %316 = vrot.lane.b32.xlu2 %v2184_v15, %s2049_s30  ;;  %1221 = vst.msk [vmem:[#allocation3 + $0x78] sm:$0x3] %vm1206_vm4, %v2050_v17 }
  0x31   : > { %1222 = vst.msk [vmem:[#allocation3 + $0x80] sm:$0xff] %vm1204_vm3, %v2050_v17 }
  0x32   : > { %1223 = vst.msk [vmem:[#allocation3 + $0x88] sm:$0x3] %vm1206_vm4, %v2050_v17 }
  0x33   : > { %1224 = vst.msk [vmem:[#allocation3 + $0x90] sm:$0xff] %vm1204_vm3, %v2050_v17 }
  0x34   : > { %1225 = vst.msk [vmem:[#allocation3 + $0x98] sm:$0x3] %vm1206_vm4, %v2050_v17  ;;  %v2550_v17 = vld [vmem:[%s2796_s3] ss:$0 sm:$0xff] }
  0x37   : > { %356 = vrot.lane.b32.xlu0 %v2179_v14, %s2049_s30 }
  0x6a   : > { %v307_v23 = vpop.permute.xlu2 %306 }
  0x6b   : > { %v328_v36 = vmax.f32 %v2119_v2, %v307_v23 }
  0x72   : > { %v315_v26 = vpop.permute.xlu2 %314 }
  0x73   : > { %v332_v37 = vmax.f32 %v2130_v5, %v315_v26  ;;  %v1870_v5 = vld [vmem:[%s2794_s1 + $0xc] sm:$0xf] }
  0x7a   : > { %v309_v33 = vpop.permute.xlu2 %308 }
  0x7b   : > { %v329_v49 = vmax.f32 %v2145_v8, %v309_v33 }
  0x81   : > { %v305_v24 = vpop.permute.xlu1 %304  ;;  %v303_v25 = vpop.permute.xlu0 %302 }
  0x82   : > { %v327_v27 = vmax.f32 %v2109_v0, %v305_v24  ;;  %v326_v30 = vmax.f32 %v2112_v1, %v303_v25  ;;  %v351_v45 = vpop.permute.xlu2 %350 }
  0x83   : > { %v370_v50 = vmax.f32 %v2160_v11, %v351_v45 }
  0x89   : > { %v345_v28 = vpop.permute.xlu1 %344  ;;  %v343_v29 = vpop.permute.xlu0 %342 }
  0x8a   : > { %v367_v31 = vmax.f32 %v2124_v3, %v345_v28  ;;  %v366_v32 = vmax.f32 %v2127_v4, %v343_v29  ;;  %v317_v23 = vpop.permute.xlu2 %316  ;;  %v1920_v28 = vld [vmem:[%s2794_s1 + $0x20] sm:$0xf] }
  0x8b   : > { %v333_v25 = vmax.f32 %v2184_v15, %v317_v23  ;;  %1921 = vmatpush.msk.msra.mxu0 %vm456_vm1, %v1920_v28  ;;  %v921_v15 = vld [vmem:[#allocation2 + $0x90] sm:$0xff] }
  0x8c   : > { %v375_v34 = vmax.f32 %v327_v27, %v367_v31  ;;  %v374_v35 = vmax.f32 %v326_v30, %v366_v32 }
  0x8e   : > { %406 = vst.msk [vmem:[#allocation2 + $0x21] sm:$0xff] %vm382_vm0, %v375_v34 }
  0x8f   : > { %405 = vst.msk [vmem:[#allocation2 + $0x11] sm:$0xff] %vm382_vm0, %v374_v35 }
  0x91   : > { %v355_v39 = vpop.permute.xlu1 %354  ;;  %v347_v40 = vpop.permute.xlu0 %346 }
  0x92   : > { %v372_v41 = vmax.f32 %v2139_v6, %v355_v39  ;;  %v368_v42 = vmax.f32 %v2142_v7, %v347_v40  ;;  %v1007_v39 = vld [vmem:[#allocation2 + $0x91] sm:$0xff] }
  0x94   : > { %v380_v43 = vmax.f32 %v332_v37, %v372_v41  ;;  %v376_v44 = vmax.f32 %v328_v36, %v368_v42 }
  0x95   : > { %v2279_v58 = vld [vmem:[#allocation2 + $0x21] sm:$0xff] }
  0x96   : > { %411 = vst.msk [vmem:[#allocation2 + $0x71] sm:$0xff] %vm382_vm0, %v380_v43  ;;  %v2263_v46 = vld [vmem:[#allocation2 + $0x11] sm:$0xff]  ;;  %v415_v59 = vld [vmem:[#allocation2 + $0x20] sm:$0xff]  ;;  %v2416_v31 = vpop.f32.mrf.mxu0  ;;  %v545_v36 = vpop.f32.mrf.mxu1 }
  0x97   : > { %v414_v47 = vld [vmem:[#allocation2 + $0x10] sm:$0xff]  ;;  %407 = vst.msk [vmem:[#allocation2 + $0x31] sm:$0xff] %vm382_vm0, %v376_v44  ;;  %1844 = vmatmul.msk.f32.gmra.mxu0 %vm382_vm0, %v2263_v46  ;;  %v2287_v60 = vld [vmem:[#allocation2 + $0x22] sm:$0xff] }
  0x98   : > { %v2265_v48 = vld [vmem:[#allocation2 + $0x12] sm:$0xff]  ;;  %1853 = vmatmul.msk.f32.gmra.mxu1 %vm382_vm0, %v414_v47 }
  0x99   : > { %1863 = vmatmul.msk.f32.gmra.mxu2 %vm382_vm0, %v2265_v48  ;;  %v349_v51 = vpop.permute.xlu0 %348  ;;  %v311_v52 = vpop.permute.xlu1 %310 }
  0x9a   : > { %v369_v53 = vmax.f32 %v2154_v9, %v349_v51  ;;  %v330_v54 = vmax.f32 %v2157_v10, %v311_v52 }
  0x9b   : > { %v623_v40 = vpop.f32.mrf.mxu2 }
  0x9c   : > { %v377_v55 = vmax.f32 %v329_v49, %v369_v53  ;;  %v378_v56 = vmax.f32 %v330_v54, %v370_v50  ;;  %v1093_v49 = vld [vmem:[#allocation2 + $0x92] sm:$0xff] }
  0x9d   : > { %v2277_v57 = vld [vmem:[#allocation2 + $0x71] sm:$0xff] }
  0x9e   : > { %1850 = vmatmul.msk.f32.vlgmr.msra.gmra.mxu3 %vm382_vm0, %v2277_v57  ;;  %408 = vst.msk [vmem:[#allocation2 + $0x41] sm:$0xff] %vm382_vm0, %v377_v55  ;;  %v2304_v3 = vld [vmem:[#allocation2 + $0x70] sm:$0xff] }
  0x9f   : > { %1845 = vmatmul.msk.f32.gmra.mxu0 %vm382_vm0, %v2279_v58  ;;  %409 = vst.msk [vmem:[#allocation2 + $0x51] sm:$0xff] %vm382_vm0, %v378_v56  ;;  %2024 = vmatpush.msk.msra.mxu3 %vm456_vm1, %v2189_v16  ;;  %v2309_v6 = vld [vmem:[#allocation2 + $0x31] sm:$0xff] }
  0xa0   : > { %1854 = vmatmul.msk.f32.gmra.mxu1 %vm382_vm0, %v415_v59  ;;  %v416_v7 = vld [vmem:[#allocation2 + $0x30] sm:$0xff] }
  0xa1   : > { %1864 = vmatmul.msk.f32.gmra.mxu2 %vm382_vm0, %v2287_v60  ;;  %v353_v63 = vpop.permute.xlu1 %352  ;;  %v313_v0 = vpop.permute.xlu0 %312  ;;  %v2317_v8 = vld [vmem:[#allocation2 + $0x32] sm:$0xff] }
  0xa2   : > { %v371_v1 = vmax.f32 %v2169_v12, %v353_v63  ;;  %v331_v2 = vmax.f32 %v2172_v13, %v313_v0  ;;  %v2326_v12 = vld [vmem:[#allocation2 + $0x72] sm:$0xff] }
  0xa4   : > { %v379_v4 = vmax.f32 %v331_v2, %v371_v1 }
  0xa5   : > { %v2322_v9 = vld [vmem:[#allocation2 + $0x41] sm:$0xff] }
  0xa6   : > { %1859 = vmatmul.msk.f32.vlgmr.msrb.gmra.mxu3 %vm382_vm0, %v2304_v3  ;;  %410 = vst.msk [vmem:[#allocation2 + $0x61] sm:$0xff] %vm382_vm0, %v379_v4  ;;  %v417_v10 = vld [vmem:[#allocation2 + $0x40] sm:$0xff]  ;;  %v2335_v13 = vld [vmem:[#allocation2 + $0x51] sm:$0xff] }
  0xa7   : > { %1846 = vmatmul.msk.f32.gmra.mxu0 %vm382_vm0, %v2309_v6  ;;  %1871 = vmatpush.msk.msrb.mxu3 %vm456_vm1, %v1870_v5  ;;  %v2324_v11 = vld [vmem:[#allocation2 + $0x42] sm:$0xff]  ;;  %v418_v16 = vld [vmem:[#allocation2 + $0x50] sm:$0xff] }
  0xa8   : > { %1855 = vmatmul.msk.f32.gmra.mxu1 %vm382_vm0, %v416_v7  ;;  %v2337_v18 = vld [vmem:[#allocation2 + $0x52] sm:$0xff] }
  0xa9   : > { %1865 = vmatmul.msk.f32.gmra.mxu2 %vm382_vm0, %v2317_v8  ;;  %v357_v24 = vpop.permute.xlu0 %356 }
  0xaa   : > { %v373_v26 = vmax.f32 %v2179_v14, %v357_v24 }
  0xac   : > { %v381_v27 = vmax.f32 %v333_v25, %v373_v26 }
  0xad   : > { %v428_v19 = vld [vmem:[#allocation2 + $0x61] sm:$0xff] }
  0xae   : > { %1869 = vmatmul.msk.f32.vlgmr.msra.gmra.mxu3 %vm382_vm0, %v2326_v12  ;;  %v419_v20 = vld [vmem:[#allocation2 + $0x60] sm:$0xff]  ;;  %412 = vst.msk [vmem:[#allocation2 + $0x81] sm:$0xff] %vm382_vm0, %v381_v27 }
  0xaf   : > { %1847 = vmatmul.msk.f32.gmra.mxu0 %vm382_vm0, %v2322_v9  ;;  %v2345_v21 = vld [vmem:[#allocation2 + $0x62] sm:$0xff]  ;;  %1911 = vmatpush.msk.msra.mxu3 %vm456_vm1, %v1910_v22 }
  0xb0   : > { %1856 = vmatmul.msk.f32.gmra.mxu1 %vm382_vm0, %v417_v10 }
  0xb1   : > { %1866 = vmatmul.msk.f32.gmra.mxu2 %vm382_vm0, %v2324_v11 }
  0xb5   : > { %v662_v14 = vld [vmem:[#allocation2 + $0x80] sm:$0xff] }
  0xb6   : > { %1872 = vmatmul.msk.f32.vlgmr.msrb.gmra.mxu3 %vm382_vm0, %v414_v47  ;;  %v748_v29 = vld [vmem:[#allocation2 + $0x81] sm:$0xff] }
  0xb7   : > { %1848 = vmatmul.msk.f32.gmra.mxu0 %vm382_vm0, %v2335_v13  ;;  %v834_v30 = vld [vmem:[#allocation2 + $0x82] sm:$0xff] }
  0xb8   : > { %1857 = vmatmul.msk.f32.gmra.mxu1 %vm382_vm0, %v418_v16 }
  0xb9   : > { %1867 = vmatmul.msk.f32.gmra.mxu2 %vm382_vm0, %v2337_v18 }
  0xbe   : > { %1873 = vmatmul.msk.f32.gmra.mxu3 %vm382_vm0, %v415_v59 }
  0xbf   : > { %1849 = vmatmul.msk.f32.gmra.mxu0 %vm382_vm0, %v428_v19 }
  0xc0   : > { %1858 = vmatmul.msk.f32.gmra.mxu1 %vm382_vm0, %v419_v20 }
  0xc1   : > { %1868 = vmatmul.msk.f32.gmra.mxu2 %vm382_vm0, %v2345_v21 }
  0xc6   : > { %1874 = vmatmul.msk.f32.gmra.mxu3 %vm382_vm0, %v416_v7 }
  0xc7   : > { %1882 = vmatmul.msk.f32.vlgmr.msrb.gmra.mxu0 %vm382_vm0, %v2263_v46 }
  0xc8   : > { %1892 = vmatmul.msk.f32.vlgmr.msrb.gmra.mxu1 %vm382_vm0, %v2265_v48 }
  0xc9   : > { %1902 = vmatmul.msk.f32.vlgmr.msrb.gmra.mxu2 %vm382_vm0, %v415_v59 }
  0xce   : > { %1875 = vmatmul.msk.f32.gmra.mxu3 %vm382_vm0, %v417_v10 }
  0xcf   : > { %1883 = vmatmul.msk.f32.gmra.mxu0 %vm382_vm0, %v2279_v58 }
  0xd0   : > { %1893 = vmatmul.msk.f32.gmra.mxu1 %vm382_vm0, %v2287_v60 }
  0xd1   : > { %1903 = vmatmul.msk.f32.gmra.mxu2 %vm382_vm0, %v416_v7 }
  0xd6   : > { %1876 = vmatmul.msk.f32.gmra.mxu3 %vm382_vm0, %v418_v16 }
  0xd7   : > { %1884 = vmatmul.msk.f32.gmra.mxu0 %vm382_vm0, %v2309_v6 }
  0xd8   : > { %1894 = vmatmul.msk.f32.gmra.mxu1 %vm382_vm0, %v2317_v8 }
  0xd9   : > { %1904 = vmatmul.msk.f32.gmra.mxu2 %vm382_vm0, %v417_v10 }
  0xde   : > { %1877 = vmatmul.msk.f32.gmra.mxu3 %vm382_vm0, %v419_v20 }
  0xdf   : > { %1885 = vmatmul.msk.f32.gmra.mxu0 %vm382_vm0, %v2322_v9 }
  0xe0   : > { %1895 = vmatmul.msk.f32.gmra.mxu1 %vm382_vm0, %v2324_v11 }
  0xe1   : > { %1905 = vmatmul.msk.f32.gmra.mxu2 %vm382_vm0, %v418_v16 }
  0xe6   : > { %1878 = vmatmul.msk.f32.gmra.mxu3 %vm382_vm0, %v2304_v3 }
  0xe7   : > { %1886 = vmatmul.msk.f32.gmra.mxu0 %vm382_vm0, %v2335_v13 }
  0xe8   : > { %1896 = vmatmul.msk.f32.gmra.mxu1 %vm382_vm0, %v2337_v18 }
  0xe9   : > { %1906 = vmatmul.msk.f32.gmra.mxu2 %vm382_vm0, %v419_v20 }
  0xee   : > { %1879 = vmatmul.msk.f32.gmra.mxu3 %vm382_vm0, %v662_v14 }
  0xef   : > { %1887 = vmatmul.msk.f32.gmra.mxu0 %vm382_vm0, %v428_v19 }
  0xf0   : > { %1897 = vmatmul.msk.f32.gmra.mxu1 %vm382_vm0, %v2345_v21 }
  0xf1   : > { %1907 = vmatmul.msk.f32.gmra.mxu2 %vm382_vm0, %v2304_v3 }
  0xf6   : > { %1912 = vmatmul.msk.f32.vlgmr.msra.gmra.mxu3 %vm382_vm0, %v2279_v58 }
  0xf7   : > { %1888 = vmatmul.msk.f32.gmra.mxu0 %vm382_vm0, %v2277_v57 }
  0xf8   : > { %1898 = vmatmul.msk.f32.gmra.mxu1 %vm382_vm0, %v2326_v12 }
  0xf9   : > { %1908 = vmatmul.msk.f32.gmra.mxu2 %vm382_vm0, %v662_v14 }
  0xfe   : > { %1913 = vmatmul.msk.f32.gmra.mxu3 %vm382_vm0, %v2309_v6 }
  0xff   : > { %1889 = vmatmul.msk.f32.gmra.mxu0 %vm382_vm0, %v748_v29 }
 0x100   : > { %1899 = vmatmul.msk.f32.gmra.mxu1 %vm382_vm0, %v834_v30 }
 0x101   : > { %1909 = vmatmul.msk.f32.gmra.mxu2 %vm382_vm0, %v921_v15 }
 0x106   : > { %1914 = vmatmul.msk.f32.gmra.mxu3 %vm382_vm0, %v2322_v9 }
 0x107   : > { %1922 = vmatmul.msk.f32.vlgmr.msra.gmra.mxu0 %vm382_vm0, %v2287_v60 }
 0x10e   : > { %1915 = vmatmul.msk.f32.gmra.mxu3 %vm382_vm0, %v2335_v13 }
 0x10f   : > { %1923 = vmatmul.msk.f32.gmra.mxu0 %vm382_vm0, %v2317_v8 }
 0x114   : > { %v2422_v32 = vpop.f32.mrf.mxu0 }
 0x115   : > { %v548_v44 = vpop.f32.mrf.mxu1 }
 0x116   : > { %1916 = vmatmul.msk.f32.gmra.mxu3 %vm382_vm0, %v428_v19  ;;  %v549_v23 = vadd.f32 %v548_v44, %v2422_v32 }
 0x117   : > { %1924 = vmatmul.msk.f32.gmra.mxu0 %vm382_vm0, %v2324_v11  ;;  %v546_v11 = vadd.f32 %v545_v36, %v2416_v31 }
 0x119   : > { %v647_v13 = vadd.f32 %v623_v40, %v546_v11 }
 0x11c   : > { %v2427_v33 = vpop.f32.mrf.mxu0  ;;  %v2445_v45 = vpop.f32.mrf.mxu2 }
 0x11d   : > { %v2452_v50 = vpop.f32.mrf.mxu1  ;;  %v648_v24 = vadd.f32 %v2445_v45, %v549_v23 }
 0x11e   : > { %1917 = vmatmul.msk.f32.gmra.mxu3 %vm382_vm0, %v2277_v57 }
 0x11f   : > { %1925 = vmatmul.msk.f32.gmra.mxu0 %vm382_vm0, %v2337_v18 }
 0x121   : > { %v498_v34 = vpop.f32.mrf.mxu3 }
 0x124   : > { %v2433_v35 = vpop.f32.mrf.mxu0  ;;  %v2454_v51 = vpop.f32.mrf.mxu2 }
 0x125   : > { %v2457_v54 = vpop.f32.mrf.mxu1 }
 0x126   : > { %1918 = vmatmul.msk.f32.gmra.mxu3 %vm382_vm0, %v748_v29 }
 0x127   : > { %1926 = vmatmul.msk.f32.gmra.mxu0 %vm382_vm0, %v2345_v21 }
 0x129   : > { %v566_v37 = vpop.f32.mrf.mxu3 }
 0x12a   : > { %v567_v38 = vadd.f32 %v566_v37, %v498_v34  ;;  %v552_v34 = vadd.f32 %v2452_v50, %v2427_v33 }
 0x12c   : > { %v2438_v41 = vpop.f32.mrf.mxu0  ;;  %v2459_v55 = vpop.f32.mrf.mxu2  ;;  %v649_v37 = vadd.f32 %v2454_v51, %v552_v34 }
 0x12d   : > { %v2463_v58 = vpop.f32.mrf.mxu1 }
 0x12e   : > { %1919 = vmatmul.msk.f32.gmra.mxu3 %vm382_vm0, %v1007_v39 }
 0x12f   : > { %1927 = vmatmul.msk.f32.gmra.mxu0 %vm382_vm0, %v2326_v12 }
 0x131   : > { %v644_v42 = vpop.f32.mrf.mxu3 }
 0x132   : > { %v2443_v43 = vadd.f32 %v644_v42, %v567_v38 }
 0x134   : > { %v2447_v46 = vpop.f32.mrf.mxu0  ;;  %v2467_v60 = vpop.f32.mrf.mxu2 }
 0x135   : > { %v2473_v63 = vpop.f32.mrf.mxu1 }
 0x137   : > { %1928 = vmatmul.msk.f32.gmra.mxu0 %vm382_vm0, %v834_v30  ;;  %v2543_v30 = vld [vmem:[%s2795_s2] ss:$0 sm:$0xff] }
 0x139   : > { %v709_v47 = vpop.f32.mrf.mxu3 }
 0x13a   : > { %v733_v16 = vadd.f32 %v709_v47, %v647_v13 }
 0x13c   : > { %v2450_v48 = vpop.f32.mrf.mxu0  ;;  %v2475_v0 = vpop.f32.mrf.mxu2 }
 0x13d   : > { %v2483_v4 = vpop.f32.mrf.mxu1 }
 0x13f   : > { %1929 = vmatmul.msk.f32.gmra.mxu0 %vm382_vm0, %v1093_v49 }
 0x141   : > { %v712_v52 = vpop.f32.mrf.mxu3 }
 0x142   : > { %v734_v26 = vadd.f32 %v712_v52, %v648_v24  ;;  %v555_v52 = vadd.f32 %v2457_v54, %v2433_v35 }
 0x144   : > { %v795_v53 = vpop.f32.mrf.mxu0  ;;  %v2485_v5 = vpop.f32.mrf.mxu2 }
 0x145   : > { %v881_v8 = vpop.f32.mrf.mxu1  ;;  %v819_v21 = vadd.f32 %v795_v53, %v733_v16 }
 0x147   : > { %v905_v25 = vadd.f32 %v881_v8, %v819_v21  ;;  %v650_v8 = vadd.f32 %v2459_v55, %v555_v52 }
 0x149   : > { %v2461_v56 = vpop.f32.mrf.mxu3 }
 0x14a   : > { %v735_v40 = vadd.f32 %v2461_v56, %v649_v37 }
 0x14c   : > { %v798_v57 = vpop.f32.mrf.mxu0  ;;  %v968_v9 = vpop.f32.mrf.mxu2 }
 0x14d   : > { %v884_v18 = vpop.f32.mrf.mxu1  ;;  %v992_v27 = vadd.f32 %v968_v9, %v905_v25  ;;  %v820_v14 = vadd.f32 %v798_v57, %v734_v26 }
 0x14f   : > { %v906_v38 = vadd.f32 %v884_v18, %v820_v14 }
 0x151   : > { %v2465_v59 = vpop.f32.mrf.mxu3 }
 0x152   : > { %v736_v11 = vadd.f32 %v2465_v59, %v650_v8 }
 0x154   : > { %v2469_v61 = vpop.f32.mrf.mxu0  ;;  %v971_v20 = vpop.f32.mrf.mxu2 }
 0x155   : > { %v887_v15 = vpop.f32.mrf.mxu1  ;;  %v993_v42 = vadd.f32 %v971_v20, %v906_v38  ;;  %v821_v47 = vadd.f32 %v2469_v61, %v735_v40  ;;  %v558_v20 = vadd.f32 %v2463_v58, %v2438_v41 }
 0x157   : > { %v907_v56 = vadd.f32 %v887_v15, %v821_v47  ;;  %v651_v21 = vadd.f32 %v2467_v60, %v558_v20 }
 0x159   : > { %v2471_v62 = vpop.f32.mrf.mxu3 }
 0x15a   : > { %v737_v26 = vadd.f32 %v2471_v62, %v651_v21 }
 0x15c   : > { %v2477_v1 = vpop.f32.mrf.mxu0  ;;  %v974_v31 = vpop.f32.mrf.mxu2 }
 0x15d   : > { %v890_v53 = vpop.f32.mrf.mxu1  ;;  %v994_v13 = vadd.f32 %v974_v31, %v907_v56  ;;  %v822_v18 = vadd.f32 %v2477_v1, %v736_v11 }
 0x15f   : > { %v908_v23 = vadd.f32 %v890_v53, %v822_v18 }
 0x161   : > { %v2479_v2 = vpop.f32.mrf.mxu3 }
 0x164   : > { %v2481_v3 = vpop.f32.mrf.mxu0  ;;  %v977_v57 = vpop.f32.mrf.mxu2 }
 0x165   : > { %v893_v24 = vpop.f32.mrf.mxu1  ;;  %v823_v14 = vadd.f32 %v2481_v3, %v737_v26 }
 0x169   : > { %v2487_v6 = vpop.f32.mrf.mxu3 }
 0x16c   : > { %v2489_v7 = vpop.f32.mrf.mxu0  ;;  %v980_v25 = vpop.f32.mrf.mxu2 }
 0x16d   : > { %v896_v37 = vpop.f32.mrf.mxu1 }
 0x171   : > { %v2501_v10 = vpop.f32.mrf.mxu3 }
 0x174   : > { %v2510_v12 = vpop.f32.mrf.mxu0  ;;  %v983_v38 = vpop.f32.mrf.mxu2 }
 0x175   : > { %v899_v53 = vpop.f32.mrf.mxu1 }
 0x179   : > { %v1054_v19 = vpop.f32.mrf.mxu3 }
 0x17a   : > { %v1078_v29 = vadd.f32 %v1054_v19, %v992_v27  ;;  %v995_v27 = vadd.f32 %v977_v57, %v908_v23 }
 0x17c   : > { %v2528_v22 = vpop.f32.mrf.mxu0 }
 0x181   : > { %v1057_v28 = vpop.f32.mrf.mxu3 }
 0x182   : > { %v1079_v33 = vadd.f32 %v1057_v28, %v993_v42 }
 0x184   : > { %v1140_v32 = vpop.f32.mrf.mxu0 }
 0x185   : > { %v1164_v36 = vadd.f32 %v1140_v32, %v1078_v29  ;;  %v561_v29 = vadd.f32 %v2473_v63, %v2447_v46  ;;  %v909_v32 = vadd.f32 %v893_v24, %v823_v14 }
 0x187   : > { %v1176_v39 = vmul.f32 %v2543_v30, %v1164_v36  ;;  %v652_v31 = vadd.f32 %v2475_v0, %v561_v29  ;;  %v996_v36 = vadd.f32 %v980_v25, %v909_v32 }
 0x189   : > { %v1188_v44 = vadd.f32 %v2550_v17, %v1176_v39  ;;  %v1060_v45 = vpop.f32.mrf.mxu3  ;;  %v738_v34 = vadd.f32 %v2479_v2, %v652_v31 }
 0x18a   : > { %v1080_v19 = vadd.f32 %v1060_v45, %v994_v13 }
 0x18b   : > { %v1196_v49 = vmax.f32 %v1188_v44, 0.0  ;;  %v824_v39 = vadd.f32 %v2489_v7, %v738_v34  ;;  %v564_v44 = vadd.f32 %v2483_v4, %v2450_v48 }
 0x18c   : > { %v1143_v50 = vpop.f32.mrf.mxu0 }
 0x18d   : > { %1227 = vst.msk [vmem:[#allocation3 + $0x11] sm:$0xff] %vm1204_vm3, %v1196_v49  ;;  %v1165_v51 = vadd.f32 %v1143_v50, %v1079_v33  ;;  %v653_v45 = vadd.f32 %v2485_v5, %v564_v44  ;;  %v910_v2 = vadd.f32 %v896_v37, %v824_v39  ;;  %v1588_v50 = vld [vmem:[#allocation3 + $0x90] sm:$0xff]  ;;  %v1235_v44 = vld [vmem:[#allocation3] sm:$0xff] }
 0x18e   : > { %1990 = vmatpush.xpose.msk.msrb.mxu0 %vm1204_vm3, %v1588_v50  ;;  %v1646_v50 = vld [vmem:[#allocation3 + $0x91] sm:$0xff] }
 0x18f   : > { %v1177_v9 = vmul.f32 %v2543_v30, %v1165_v51  ;;  %v739_v33 = vadd.f32 %v2487_v6, %v653_v45  ;;  %v997_v49 = vadd.f32 %v983_v38, %v910_v2  ;;  %v986_v51 = vpop.f32.mrf.mxu2  ;;  %v1930_v45 = vld [vmem:[%s2797_s4 + $0x8] sm:$0xff] }
 0x191   : > { %v1189_v61 = vadd.f32 %v2550_v17, %v1177_v9  ;;  %v1063_v16 = vpop.f32.mrf.mxu3  ;;  %v825_v52 = vadd.f32 %v2510_v12, %v739_v33  ;;  %v740_v9 = vadd.f32 %v2501_v10, %v2443_v43  ;;  %v1949_v33 = vld [vmem:[%s2797_s4 + $0x10] sm:$0xff] }
 0x192   : > { %v1081_v15 = vadd.f32 %v1063_v16, %v995_v27 }
 0x193   : > { %v1197_v35 = vmax.f32 %v1189_v61, 0.0  ;;  %v911_v56 = vadd.f32 %v899_v53, %v825_v52  ;;  %v826_v12 = vadd.f32 %v2528_v22, %v740_v9  ;;  %v1704_v52 = vld [vmem:[#allocation3 + $0x92] sm:$0xff]  ;;  %v1969_v53 = vld [vmem:[%s2797_s4 + $0x20] sm:$0xff] }
 0x194   : > { %v1146_v54 = vpop.f32.mrf.mxu0 }
 0x195   : > { %1228 = vst.msk [vmem:[#allocation3 + $0x21] sm:$0xff] %vm1204_vm3, %v1197_v35  ;;  %v1166_v55 = vadd.f32 %v1146_v54, %v1080_v19  ;;  %v998_v11 = vadd.f32 %v986_v51, %v911_v56  ;;  %v902_v35 = vpop.f32.mrf.mxu1  ;;  %v1755_v51 = vld [vmem:[%s2798_s5] sm:$0xff] }
 0x196   : > { %v912_v20 = vadd.f32 %v902_v35, %v826_v12  ;;  %v2009_v56 = vld [vmem:[%s2797_s4 + $0x40] sm:$0xff] }
 0x197   : > { %v1178_v59 = vmul.f32 %v2543_v30, %v1166_v55  ;;  %v989_v54 = vpop.f32.mrf.mxu2 }
 0x198   : > { %v999_v23 = vadd.f32 %v989_v54, %v912_v20 }
 0x199   : > { %v1190_v1 = vadd.f32 %v2550_v17, %v1178_v59  ;;  %v1066_v28 = vpop.f32.mrf.mxu3 }
 0x19a   : > { %v1082_v40 = vadd.f32 %v1066_v28, %v996_v36 }
 0x19b   : > { %v1198_v41 = vmax.f32 %v1190_v1, 0.0 }
 0x19c   : > { %v1149_v58 = vpop.f32.mrf.mxu0  ;;  %v1237_v38 = vld [vmem:[#allocation3 + $0x20] sm:$0xff] }
 0x19d   : > { %1229 = vst.msk [vmem:[#allocation3 + $0x31] sm:$0xff] %vm1204_vm3, %v1198_v41  ;;  %v1167_v60 = vadd.f32 %v1149_v58, %v1081_v15  ;;  %v2664_v39 = vld [vmem:[#allocation3 + $0x22] sm:$0xff] }
 0x19f   : > { %v1179_v62 = vmul.f32 %v2543_v30, %v1167_v60 }
 0x1a1   : > { %v1191_v3 = vadd.f32 %v2550_v17, %v1179_v62  ;;  %v1069_v46 = vpop.f32.mrf.mxu3 }
 0x1a2   : > { %v1083_v48 = vadd.f32 %v1069_v46, %v997_v49  ;;  %v1349_v46 = vld [vmem:[#allocation3 + $0x12] sm:$0xff] }
 0x1a3   : > { %v1199_v42 = vmax.f32 %v1191_v3, 0.0  ;;  %v2659_v3 = vld [vmem:[#allocation3 + $0x21] sm:$0xff] }
 0x1a4   : > { %v1152_v63 = vpop.f32.mrf.mxu0  ;;  %v2648_v34 = vld [vmem:[#allocation3 + $0x31] sm:$0xff] }
 0x1a5   : > { %1230 = vst.msk [vmem:[#allocation3 + $0x41] sm:$0xff] %vm1204_vm3, %v1199_v42  ;;  %v1168_v0 = vadd.f32 %v1152_v63, %v1082_v40  ;;  %v1238_v36 = vld [vmem:[#allocation3 + $0x30] sm:$0xff]  ;;  %v1244_v63 = vld [vmem:[#allocation3 + $0x1] sm:$0xff] }
 0x1a6   : > { %v2653_v37 = vld [vmem:[#allocation3 + $0x32] sm:$0xff] }
 0x1a7   : > { %v1180_v47 = vmul.f32 %v2543_v30, %v1168_v0  ;;  %v1245_v40 = vld [vmem:[#allocation3 + $0x11] sm:$0xff]  ;;  %v1348_v0 = vld [vmem:[#allocation3 + $0x2] sm:$0xff] }
 0x1a8   : > { %v1236_v42 = vld [vmem:[#allocation3 + $0x10] sm:$0xff] }
 0x1a9   : > { %v1192_v7 = vadd.f32 %v2550_v17, %v1180_v47  ;;  %v1072_v8 = vpop.f32.mrf.mxu3  ;;  %v1243_v47 = vld [vmem:[%s2797_s4] sm:$0xff] }
 0x1aa   : > { %v1084_v61 = vadd.f32 %v1072_v8, %v998_v11  ;;  %v1999_v8 = vld [vmem:[%s2797_s4 + $0x38] sm:$0xff] }
 0x1ab   : > { %v1200_v4 = vmax.f32 %v1192_v7, 0.0  ;;  %v1989_v7 = vld [vmem:[%s2797_s4 + $0x30] sm:$0xff] }
 0x1ac   : > { %v1155_v57 = vpop.f32.mrf.mxu0  ;;  %v2637_v31 = vld [vmem:[#allocation3 + $0x41] sm:$0xff] }
 0x1ad   : > { %1231 = vst.msk [vmem:[#allocation3 + $0x51] sm:$0xff] %vm1204_vm3, %v1200_v4  ;;  %v1169_v5 = vadd.f32 %v1155_v57, %v1083_v48  ;;  %v1239_v32 = vld [vmem:[#allocation3 + $0x40] sm:$0xff]  ;;  %v1959_v48 = vld [vmem:[%s2797_s4 + $0x18] sm:$0xff]  ;;  %v1979_v4 = vld [vmem:[%s2797_s4 + $0x28] sm:$0xff]  ;;  %v2051_v57 = vmov 0  }
 0x1ae   : > { %v2642_v62 = vld [vmem:[#allocation3 + $0x42] sm:$0xff]  ;;  %2036 = vset.pattern.permute.xlu1 %v2051_v57  ;;  %2037 = vset.pattern.permute.xlu2 %v2051_v57 }
 0x1af   : > { %v1181_v6 = vmul.f32 %v2543_v30, %v1169_v5  ;;  %v1762_v5 = vld [vmem:[%s2799_s6] sm:$0xff]  ;;  %1758 = vperm.xlu1 %2036, %v1755_v51   ;;  %2038 = vset.pattern.permute.xlu0 %v2051_v57 }
 0x1b0   : > { %1765 = vperm.xlu2 %2037, %v1762_v5  }
 0x1b1   : > { %v1193_v13 = vadd.f32 %v2550_v17, %v1181_v6  ;;  %v1075_v21 = vpop.f32.mrf.mxu3 }
 0x1b2   : > { %v1085_v10 = vadd.f32 %v1075_v21, %v999_v23 }
 0x1b3   : > { %v1201_v16 = vmax.f32 %v1193_v13, 0.0 }
 0x1b4   : > { %v1158_v18 = vpop.f32.mrf.mxu0  ;;  %v2627_v41 = vld [vmem:[#allocation3 + $0x51] sm:$0xff] }
 0x1b5   : > { %1232 = vst.msk [vmem:[#allocation3 + $0x61] sm:$0xff] %vm1204_vm3, %v1201_v16  ;;  %v1170_v19 = vadd.f32 %v1158_v18, %v1084_v61  ;;  %v1240_v58 = vld [vmem:[#allocation3 + $0x50] sm:$0xff] }
 0x1b6   : > { %v2632_v60 = vld [vmem:[#allocation3 + $0x52] sm:$0xff] }
 0x1b7   : > { %v1182_v55 = vmul.f32 %v2543_v30, %v1170_v19 }
 0x1b9   : > { %v1194_v43 = vadd.f32 %v2550_v17, %v1182_v55 }
 0x1bb   : > { %v1202_v24 = vmax.f32 %v1194_v43, 0.0 }
 0x1bc   : > { %v1161_v59 = vpop.f32.mrf.mxu0  ;;  %v2623_v15 = vld [vmem:[#allocation3 + $0x62] sm:$0xff] }
 0x1bd   : > { %1233 = vst.msk [vmem:[#allocation3 + $0x71] sm:$0xff] %vm1204_vm3, %v1202_v24  ;;  %v1171_v22 = vadd.f32 %v1161_v59, %v1085_v10 }
 0x1bf   : > { %v1183_v25 = vmul.f32 %v2543_v30, %v1171_v22  ;;  %v2615_v30 = vld [vmem:[#allocation3 + $0x61] sm:$0xff] }
 0x1c1   : > { %v1195_v26 = vadd.f32 %v2550_v17, %v1183_v25  ;;  %v2617_v17 = vld [vmem:[#allocation3 + $0x60] sm:$0xff] }
 0x1c3   : > { %v1203_v27 = vmax.f32 %v1195_v26, 0.0 }
 0x1c4   : > { %v2602_v1 = vld [vmem:[#allocation3 + $0x71] sm:$0xff] }
 0x1c5   : > { %v2604_v28 = vld [vmem:[#allocation3 + $0x70] sm:$0xff]  ;;  %1234 = vst.msk [vmem:[#allocation3 + $0x81] sm:$0xff] %vm1204_vm3, %v1203_v27  ;;  %1931 = vmatpush.xpose.msk.msra.mxu1 %vm1204_vm3, %v2602_v1 }
 0x1c6   : > { %v2606_v14 = vld [vmem:[#allocation3 + $0x72] sm:$0xff]  ;;  %1940 = vmatpush.xpose.msk.msra.mxu2 %vm1204_vm3, %v2604_v28 }
 0x1c7   : > { %1950 = vmatpush.xpose.msk.msrb.mxu3 %vm1204_vm3, %v2606_v14 }
 0x1c9   : > { %1932 = vmatpush.xpose.msk.msra.mxu1 %vm1204_vm3, %v2615_v30 }
 0x1ca   : > { %1941 = vmatpush.xpose.msk.msra.mxu2 %vm1204_vm3, %v2617_v17 }
 0x1cb   : > { %1951 = vmatpush.xpose.msk.msrb.mxu3 %vm1204_vm3, %v2623_v15 }
 0x1cc   : > { %v1587_v29 = vld [vmem:[#allocation3 + $0x80] sm:$0xff] }
 0x1cd   : > { %1933 = vmatpush.xpose.msk.msra.mxu1 %vm1204_vm3, %v2627_v41  ;;  %1991 = vmatpush.xpose.msk.msrb.mxu0 %vm1204_vm3, %v1587_v29  ;;  %v1471_v2 = vld [vmem:[#allocation3 + $0x81] sm:$0xff] }
 0x1ce   : > { %1942 = vmatpush.xpose.msk.msra.mxu2 %vm1204_vm3, %v1240_v58  ;;  %v1529_v49 = vld [vmem:[#allocation3 + $0x82] sm:$0xff] }
 0x1cf   : > { %1952 = vmatpush.xpose.msk.msrb.mxu3 %vm1204_vm3, %v2632_v60 }
 0x1d1   : > { %1934 = vmatpush.xpose.msk.msra.mxu1 %vm1204_vm3, %v2637_v31  ;;  %1992 = vmatpush.xpose.msk.msrb.mxu0 %vm1204_vm3, %v2604_v28 }
 0x1d2   : > { %1943 = vmatpush.xpose.msk.msra.mxu2 %vm1204_vm3, %v1239_v32 }
 0x1d3   : > { %1953 = vmatpush.xpose.msk.msrb.mxu3 %vm1204_vm3, %v2642_v62 }
 0x1d5   : > { %1935 = vmatpush.xpose.msk.msra.mxu1 %vm1204_vm3, %v2648_v34  ;;  %1993 = vmatpush.xpose.msk.msrb.mxu0 %vm1204_vm3, %v2617_v17 }
 0x1d6   : > { %1944 = vmatpush.xpose.msk.msra.mxu2 %vm1204_vm3, %v1238_v36 }
 0x1d7   : > { %1954 = vmatpush.xpose.msk.msrb.mxu3 %vm1204_vm3, %v2653_v37 }
 0x1d9   : > { %1936 = vmatpush.xpose.msk.msra.mxu1 %vm1204_vm3, %v2659_v3  ;;  %1994 = vmatpush.xpose.msk.msrb.mxu0 %vm1204_vm3, %v1240_v58 }
 0x1da   : > { %1945 = vmatpush.xpose.msk.msra.mxu2 %vm1204_vm3, %v1237_v38 }
 0x1db   : > { %1955 = vmatpush.xpose.msk.msrb.mxu3 %vm1204_vm3, %v2664_v39 }
 0x1dd   : > { %1937 = vmatpush.xpose.msk.msra.mxu1 %vm1204_vm3, %v1245_v40  ;;  %1995 = vmatpush.xpose.msk.msrb.mxu0 %vm1204_vm3, %v1239_v32 }
 0x1de   : > { %1946 = vmatpush.xpose.msk.msra.mxu2 %vm1204_vm3, %v1236_v42 }
 0x1df   : > { %1956 = vmatpush.xpose.msk.msrb.mxu3 %vm1204_vm3, %v1349_v46 }
 0x1e1   : > { %1938 = vmatpush.xpose.msk.msra.mxu1 %vm1204_vm3, %v1244_v63  ;;  %1996 = vmatpush.xpose.msk.msrb.mxu0 %vm1204_vm3, %v1238_v36 }
 0x1e2   : > { %1947 = vmatpush.xpose.msk.msra.mxu2 %vm1204_vm3, %v1235_v44 }
 0x1e3   : > { %1957 = vmatpush.xpose.msk.msrb.mxu3 %vm1204_vm3, %v1348_v0 }
 0x1e4   : > { %1939 = vmatmul.msk.f32.vlgmr.msra.gmra.mxu1 %vm1204_vm3, %v1930_v45 }
 0x1e5   : > { %1960 = vmatpush.xpose.msk.msrb.mxu1 %vm1204_vm3, %v1587_v29  ;;  %1948 = vmatmul.msk.f32.vlgmr.msra.gmra.mxu2 %vm1204_vm3, %v1243_v47 }
 0x1e6   : > { %1970 = vmatpush.xpose.msk.msrb.mxu2 %vm1204_vm3, %v1471_v2  ;;  %1958 = vmatmul.msk.f32.vlgmr.msrb.gmra.mxu3 %vm1204_vm3, %v1949_v33 }
 0x1e7   : > { %1980 = vmatpush.xpose.msk.msra.mxu3 %vm1204_vm3, %v1529_v49  ;;  %1997 = vmatpush.xpose.msk.msrb.mxu0 %vm1204_vm3, %v1237_v38 }
 0x1e9   : > { %1961 = vmatpush.xpose.msk.msrb.mxu1 %vm1204_vm3, %v2604_v28 }
 0x1ea   : > { %1971 = vmatpush.xpose.msk.msrb.mxu2 %vm1204_vm3, %v2602_v1  ;;  %1998 = vmatmul.msk.f32.vlgmr.msrb.gmra.mxu0 %vm1204_vm3, %v1989_v7 }
 0x1eb   : > { %1981 = vmatpush.xpose.msk.msra.mxu3 %vm1204_vm3, %v2606_v14 }
 0x1ed   : > { %1962 = vmatpush.xpose.msk.msrb.mxu1 %vm1204_vm3, %v2617_v17 }
 0x1ee   : > { %1972 = vmatpush.xpose.msk.msrb.mxu2 %vm1204_vm3, %v2615_v30 }
 0x1ef   : > { %1982 = vmatpush.xpose.msk.msra.mxu3 %vm1204_vm3, %v2623_v15 }
 0x1f1   : > { %1963 = vmatpush.xpose.msk.msrb.mxu1 %vm1204_vm3, %v1240_v58 }
 0x1f2   : > { %1973 = vmatpush.xpose.msk.msrb.mxu2 %vm1204_vm3, %v2627_v41 }
 0x1f3   : > { %1983 = vmatpush.xpose.msk.msra.mxu3 %vm1204_vm3, %v2632_v60 }
 0x1f5   : > { %1964 = vmatpush.xpose.msk.msrb.mxu1 %vm1204_vm3, %v1239_v32 }
 0x1f6   : > { %1974 = vmatpush.xpose.msk.msrb.mxu2 %vm1204_vm3, %v2637_v31 }
 0x1f7   : > { %1984 = vmatpush.xpose.msk.msra.mxu3 %vm1204_vm3, %v2642_v62 }
 0x1f9   : > { %1965 = vmatpush.xpose.msk.msrb.mxu1 %vm1204_vm3, %v1238_v36 }
 0x1fa   : > { %1975 = vmatpush.xpose.msk.msrb.mxu2 %vm1204_vm3, %v2648_v34 }
 0x1fb   : > { %1985 = vmatpush.xpose.msk.msra.mxu3 %vm1204_vm3, %v2653_v37 }
 0x1fd   : > { %1966 = vmatpush.xpose.msk.msrb.mxu1 %vm1204_vm3, %v1237_v38 }
 0x1fe   : > { %1976 = vmatpush.xpose.msk.msrb.mxu2 %vm1204_vm3, %v2659_v3 }
 0x1ff   : > { %1986 = vmatpush.xpose.msk.msra.mxu3 %vm1204_vm3, %v2664_v39 }
 0x201   : > { %1967 = vmatpush.xpose.msk.msrb.mxu1 %vm1204_vm3, %v1236_v42 }
 0x202   : > { %1977 = vmatpush.xpose.msk.msrb.mxu2 %vm1204_vm3, %v1245_v40 }
 0x203   : > { %1987 = vmatpush.xpose.msk.msra.mxu3 %vm1204_vm3, %v1349_v46 }
 0x204   : > { %1968 = vmatmul.msk.f32.vlgmr.msrb.gmra.mxu1 %vm1204_vm3, %v1959_v48 }
 0x205   : > { %2000 = vmatpush.xpose.msk.msra.mxu1 %vm1204_vm3, %v1646_v50  ;;  %1978 = vmatmul.msk.f32.vlgmr.msrb.gmra.mxu2 %vm1204_vm3, %v1969_v53 }
 0x206   : > { %2010 = vmatpush.xpose.msk.msra.mxu2 %vm1204_vm3, %v1704_v52  ;;  %1988 = vmatmul.msk.f32.vlgmr.msra.gmra.mxu3 %vm1204_vm3, %v1979_v4 }
 0x209   : > { %2001 = vmatpush.xpose.msk.msra.mxu1 %vm1204_vm3, %v1471_v2 }
 0x20a   : > { %2011 = vmatpush.xpose.msk.msra.mxu2 %vm1204_vm3, %v1529_v49  ;;  %v1766_v59 = vpop.permute.xlu2 %1765 }
 0x20d   : > { %2002 = vmatpush.xpose.msk.msra.mxu1 %vm1204_vm3, %v2602_v1 }
 0x20e   : > { %2012 = vmatpush.xpose.msk.msra.mxu2 %vm1204_vm3, %v2606_v14 }
 0x211   : > { %2003 = vmatpush.xpose.msk.msra.mxu1 %vm1204_vm3, %v2615_v30 }
 0x212   : > { %2013 = vmatpush.xpose.msk.msra.mxu2 %vm1204_vm3, %v2623_v15 }
 0x215   : > { %2004 = vmatpush.xpose.msk.msra.mxu1 %vm1204_vm3, %v2627_v41 }
 0x216   : > { %2014 = vmatpush.xpose.msk.msra.mxu2 %vm1204_vm3, %v2632_v60 }
 0x219   : > { %2005 = vmatpush.xpose.msk.msra.mxu1 %vm1204_vm3, %v2637_v31 }
 0x21a   : > { %2015 = vmatpush.xpose.msk.msra.mxu2 %vm1204_vm3, %v2642_v62 }
 0x21d   : > { %2006 = vmatpush.xpose.msk.msra.mxu1 %vm1204_vm3, %v2648_v34 }
 0x21e   : > { %2016 = vmatpush.xpose.msk.msra.mxu2 %vm1204_vm3, %v2653_v37 }
 0x221   : > { %2007 = vmatpush.xpose.msk.msra.mxu1 %vm1204_vm3, %v2659_v3  ;;  %v1759_v10 = vpop.permute.xlu1 %1758 }
 0x222   : > { %2017 = vmatpush.xpose.msk.msra.mxu2 %vm1204_vm3, %v2664_v39 }
 0x224   : > { %2008 = vmatmul.msk.f32.vlgmr.msra.gmra.mxu1 %vm1204_vm3, %v1999_v8 }
 0x225   : > { %2018 = vmatmul.msk.f32.vlgmr.msra.gmra.mxu2 %vm1204_vm3, %v2009_v56 }
 0x261   : > { %v1298_v6 = vpop.f32.mrf.mxu1 }
 0x267   : > { %v1635_v20 = vpop.f32.mrf.mxu0 }
 0x268   : > { %v1345_v9 = vpop.f32.mrf.mxu2 }
 0x269   : > { %v1346_v11 = vadd.f32 %v1345_v9, %v1298_v6  ;;  %v1402_v13 = vpop.f32.mrf.mxu3 }
 0x26b   : > { %v1405_v12 = vadd.f32 %v1402_v13, %v1346_v11 }
 0x281   : > { %v1460_v61 = vpop.f32.mrf.mxu1 }
 0x282   : > { %v1463_v16 = vadd.f32 %v1460_v61, %v1405_v12 }
 0x288   : > { %v1518_v18 = vpop.f32.mrf.mxu2 }
 0x289   : > { %v1521_v19 = vadd.f32 %v1518_v18, %v1463_v16  ;;  %v1576_v35 = vpop.f32.mrf.mxu3 }
 0x28b   : > { %v1579_v54 = vadd.f32 %v1576_v35, %v1521_v19 }
 0x28d   : > { %v1638_v21 = vadd.f32 %v1635_v20, %v1579_v54 }
 0x2a1   : > { %v1693_v55 = vpop.f32.mrf.mxu1 }
 0x2a2   : > { %v1696_v23 = vadd.f32 %v1693_v55, %v1638_v21 }
 0x2a8   : > { %v1751_v43 = vpop.f32.mrf.mxu2 }
 0x2a9   : > { %v1754_v24 = vadd.f32 %v1751_v43, %v1696_v23 }
 0x2ab   : > { %v1761_v22 = vmul.f32 %v1759_v10, %v1754_v24 }
 0x2ad   : > { %v1768_v25 = vadd.f32 %v1766_v59, %v1761_v22 }
 0x2af   : > { %v1769_v26 = vmax.f32 %v1768_v25, 0.0 }
 0x2b1   : > { %1771 = vst.msk [vmem:[%s276_s13] sm:$0xff] %vm1770_vm5, %v1769_v26 }
 0x2b2 PF: > { %s17_s24 = sadd.s32 1, %s2047_s24  }
 0x2b3   : > { %p14_p4 = scmp.ge.s32.totalorder %s17_s24, 4  }
 0x2b5   :  { %16 = sbr.rel (!%p14_p4) target bundleno = 1 (0x1), region = 99 }

</bundles_post_ra>
